<compile_context>
chip_gen: v5e
topology: v5e:2x2
jax: 0.10.0
libtpu: 0.0.40
codegen_flags: <defaults>
</compile_context>

<pallas_src>
import numpy as np
import jax
import jax.numpy as jnp
from jax.experimental import pallas as pl
from jax.experimental.pallas import tpu as pltpu

# --------------------------- small synthetic shapes ---------------------------
B = 2
C_IN = 4
H = W = 16
FEAT = 32        # stand-in for resnet50.fc.in_features (=2048)
PROJ_HID = 64    # args.proj_hidden
PROJ_OUT = 32    # args.proj_out
PRED_HID = 16    # args.pred_hidden
PRED_OUT = 32    # args.pred_out (must equal PROJ_OUT for the D loss)
BN_EPS = 1e-5
NORM_EPS = 1e-12

LANE = 128                 # padded lane width for every feature dim
NVIEWS = 2
ROWS = NVIEWS * B          # stacked head batch (view1 rows then view2 rows)
K_PATCH = 9 * C_IN         # im2col contraction dim (3x3 conv)

assert max(FEAT, PROJ_HID, PROJ_OUT, PRED_HID, PRED_OUT, K_PATCH) <= LANE
assert PRED_OUT == PROJ_OUT

# vec_stack row indices (bias / gamma / beta vectors, each padded to 128 lanes)
V_CONV_B = 0
V_PB1, V_PG1, V_PBE1 = 1, 2, 3
V_PB2, V_PG2, V_PBE2 = 4, 5, 6
V_PB3, V_PG3, V_PBE3 = 7, 8, 9
V_QB1, V_QG1, V_QBE1 = 10, 11, 12
V_QB2 = 13
N_VEC_ROWS = 16            # padded to a multiple of 8 sublanes

# w_stack slab indices (each weight padded to (128, 128))
W_P1, W_P2, W_P3, W_Q1, W_Q2 = 0, 1, 2, 3, 4


# ------------------------------- fused kernel --------------------------------
def simsiam_fused_kernel(patches_ref, conv_w_ref, w_ref, vec_ref, out_ref):
    """Backbone (both views) + projection + prediction + D losses, fused.

    patches_ref: (ROWS*H*W, LANE)  lane-padded im2col patches, views stacked
    conv_w_ref:  (LANE, LANE)      conv weight (K x FEAT, zero padded)
    w_ref:       (5, LANE, LANE)   packed head weight matrices
    vec_ref:     (16, LANE)        packed bias / gamma / beta row-vectors
    out_ref:     (2, LANE)         row 0 = d1 (broadcast), row 1 = d2
    """
    f32 = jnp.float32
    hw = H * W

    def vec(i):
        return vec_ref[i:i + 1, :]                     # (1, LANE)

    # ---- backbone: conv-as-matmul + ReLU + global average pool ----
    act = jnp.dot(patches_ref[...], conv_w_ref[...],
                  preferred_element_type=f32) + vec(V_CONV_B)
    act = jnp.maximum(act, 0.0)                        # (ROWS*HW, LANE)
    feats = jnp.mean(act.reshape(ROWS, hw, LANE), axis=1)   # (ROWS, LANE)

    # ---- per-view masks: rows [0:B] = view 1, rows [B:2B] = view 2 ----
    row = jax.lax.broadcasted_iota(jnp.int32, (ROWS, 1), 0)
    m1 = (row < B).astype(f32)
    m2 = 1.0 - m1
    inv_b = 1.0 / float(B)

    def linear(x, wi, bi):
        return jnp.dot(x, w_ref[wi], preferred_element_type=f32) + vec(bi)

    def bn(x, gi, bi):
        # BatchNorm1d, training mode (biased batch variance), statistics
        # computed independently per view (per B-row half of the stacked batch)
        # so the result is identical to two separate forwards.
        mu = m1 * (jnp.sum(x * m1, axis=0, keepdims=True) * inv_b) \
           + m2 * (jnp.sum(x * m2, axis=0, keepdims=True) * inv_b)
        d = x - mu
        var = m1 * (jnp.sum(d * d * m1, axis=0, keepdims=True) * inv_b) \
            + m2 * (jnp.sum(d * d * m2, axis=0, keepdims=True) * inv_b)
        return vec(gi) * d * jax.lax.rsqrt(var + BN_EPS) + vec(bi)

    def relu(x):
        return jnp.maximum(x, 0.0)

    # ---- projection MLP (both views in one matmul per layer) ----
    h = relu(bn(linear(feats, W_P1, V_PB1), V_PG1, V_PBE1))
    h = relu(bn(linear(h, W_P2, V_PB2), V_PG2, V_PBE2))
    z = bn(linear(h, W_P3, V_PB3), V_PG3, V_PBE3)      # (ROWS, LANE)

    # ---- prediction MLP ----
    h = relu(bn(linear(z, W_Q1, V_QB1), V_QG1, V_QBE1))
    p = linear(h, W_Q2, V_QB2)                         # (ROWS, LANE)

    # ---- D loss (z.detach() only affects gradients; forward unchanged) ----
    def l2norm(v):
        ss = jnp.sum(v * v, axis=1, keepdims=True)
        return v * jax.lax.rsqrt(jnp.maximum(ss, NORM_EPS * NORM_EPS))

    pn = l2norm(p)
    zn = l2norm(z)
    p1, p2 = pn[0:B], pn[B:ROWS]
    z1, z2 = zn[0:B], zn[B:ROWS]

    d1 = -0.5 * jnp.mean(jnp.sum(p1 * z2, axis=1, keepdims=True),
                         axis=0, keepdims=True)        # (1, 1) = D(p1, z2) / 2
    d2 = -0.5 * jnp.mean(jnp.sum(p2 * z1, axis=1, keepdims=True),
                         axis=0, keepdims=True)        # (1, 1) = D(p2, z1) / 2

    out_ref[...] = jnp.concatenate([d1, d2], axis=0) * jnp.ones((2, LANE), f32)


# --------------------------------- JAX glue -----------------------------------
def im2col_2d(x_nhwc, kh=3, kw=3):
    """(N, H, W, C) -> (N*H*W, kh*kw*C) patches for a stride-1, pad-1 conv."""
    n, h, w, c = x_nhwc.shape
    xp = jnp.pad(x_nhwc, ((0, 0), (1, 1), (1, 1), (0, 0)))
    cols = [xp[:, i:i + h, j:j + w, :] for i in range(kh) for j in range(kw)]
    patches = jnp.concatenate(cols, axis=-1)           # (N, H, W, kh*kw*C)
    return patches.reshape(n * h * w, kh * kw * c)


@jax.jit
def model_forward(packed, x1, x2):
    # Stack both views -> one backbone matmul; NCHW -> NHWC -> im2col.
    x = jnp.concatenate([x1, x2], axis=0)              # (2B, C, H, W)
    x = jnp.transpose(x, (0, 2, 3, 1))                 # NHWC
    patches = im2col_2d(x)                             # (2B*H*W, 9*C)
    patches = jnp.pad(patches, ((0, 0), (0, LANE - patches.shape[1])))

    out = pl.pallas_call(
        simsiam_fused_kernel,
        out_shape=jax.ShapeDtypeStruct((2, LANE), jnp.float32),
        in_specs=[pl.BlockSpec(memory_space=pltpu.MemorySpace.VMEM)] * 4,
        out_specs=pl.BlockSpec(memory_space=pltpu.MemorySpace.VMEM),
        compiler_params=pltpu.CompilerParams(vmem_limit_bytes=32 * 1024 * 1024),
    )(patches, packed['conv_w'], packed['w_stack'], packed['vec_stack'])
    return out[0, 0], out[1, 0]


# ---------------------------- deterministic params ----------------------------
def init_params(key):
    keys = jax.random.split(key, 8)

    def lin(k, din, dout):
        k1, k2 = jax.random.split(k)
        bound = 1.0 / float(np.sqrt(din))
        w = jax.random.uniform(k1, (din, dout), jnp.float32,
                               minval=-bound, maxval=bound)
        b = jax.random.uniform(k2, (1, dout), jnp.float32,
                               minval=-bound, maxval=bound)
        return w, b

    p = {}
    p['conv_w'], p['conv_b'] = lin(keys[0], K_PATCH, FEAT)
    p['pw1'], p['pb1'] = lin(keys[1], FEAT, PROJ_HID)
    p['pg1'], p['pB1'] = jnp.ones((1, PROJ_HID), jnp.float32), jnp.zeros((1, PROJ_HID), jnp.float32)
    p['pw2'], p['pb2'] = lin(keys[2], PROJ_HID, PROJ_HID)
    p['pg2'], p['pB2'] = jnp.ones((1, PROJ_HID), jnp.float32), jnp.zeros((1, PROJ_HID), jnp.float32)
    p['pw3'], p['pb3'] = lin(keys[3], PROJ_HID, PROJ_OUT)
    p['pg3'], p['pB3'] = jnp.ones((1, PROJ_OUT), jnp.float32), jnp.zeros((1, PROJ_OUT), jnp.float32)
    p['qw1'], p['qb1'] = lin(keys[4], PROJ_OUT, PRED_HID)
    p['qg1'], p['qB1'] = jnp.ones((1, PRED_HID), jnp.float32), jnp.zeros((1, PRED_HID), jnp.float32)
    p['qw2'], p['qb2'] = lin(keys[5], PRED_HID, PRED_OUT)
    return p


def pack_params(p):
    """Zero-pad every feature dim to 128 lanes and pack into 3 arrays."""
    def pad_mat(w):
        return jnp.pad(w, ((0, LANE - w.shape[0]), (0, LANE - w.shape[1])))

    def pad_vec(v):
        return jnp.pad(v, ((0, 0), (0, LANE - v.shape[1])))

    w_stack = jnp.stack([pad_mat(p['pw1']), pad_mat(p['pw2']), pad_mat(p['pw3']),
                         pad_mat(p['qw1']), pad_mat(p['qw2'])], axis=0)

    vec_rows = [p['conv_b'],
                p['pb1'], p['pg1'], p['pB1'],
                p['pb2'], p['pg2'], p['pB2'],
                p['pb3'], p['pg3'], p['pB3'],
                p['qb1'], p['qg1'], p['qB1'],
                p['qb2']]
    vec_stack = jnp.concatenate(
        [pad_vec(v) for v in vec_rows]
        + [jnp.zeros((N_VEC_ROWS - len(vec_rows), LANE), jnp.float32)], axis=0)

    return {'conv_w': pad_mat(p['conv_w']),
            'w_stack': w_stack,
            'vec_stack': vec_stack}


if __name__ == "__main__":
    key = jax.random.PRNGKey(0)
    k_params, k_x1, k_x2 = jax.random.split(key, 3)
    params = init_params(k_params)
    packed = pack_params(params)

    # PyTorch-style NCHW inputs.
    x1 = jax.random.normal(k_x1, (B, C_IN, H, W), jnp.float32)
    x2 = jax.random.normal(k_x2, (B, C_IN, H, W), jnp.float32)

    d1, d2 = model_forward(packed, x1, x2)
    d1, d2 = jax.block_until_ready((d1, d2))

    assert jnp.isfinite(d1) and jnp.isfinite(d2)
    # Each term is half of a negative mean cosine similarity -> in [-0.5, 0.5].
    assert -0.5 - 1e-5 <= float(d1) <= 0.5 + 1e-5
    assert -0.5 - 1e-5 <= float(d2) <= 0.5 + 1e-5
    print("KERNEL_OK")
</pallas_src>

<mosaic_0001>
module attributes {stable_mosaic.version = 11 : i64} {
  func.func @simsiam_fused_kernel(%arg0: memref<1024x128xf32, #tpu.memory_space<vmem>>, %arg1: memref<128x128xf32, #tpu.memory_space<vmem>>, %arg2: memref<5x128x128xf32, #tpu.memory_space<vmem>>, %arg3: memref<16x128xf32, #tpu.memory_space<vmem>>, %arg4: memref<2x128xf32, #tpu.memory_space<vmem>>) attributes {dimension_semantics = [], scalar_prefetch = 0 : i64, scratch_operands = 0 : i64, tpu.core_type = #tpu.core_type<tc>} {
    %c0 = arith.constant 0 : index
    %c0_0 = arith.constant 0 : index
    %0 = vector.load %arg0[%c0, %c0_0] : memref<1024x128xf32, #tpu.memory_space<vmem>>, vector<1024x128xf32>
    %c0_1 = arith.constant 0 : index
    %c0_2 = arith.constant 0 : index
    %1 = vector.load %arg1[%c0_1, %c0_2] : memref<128x128xf32, #tpu.memory_space<vmem>>, vector<128x128xf32>
    %cst = arith.constant dense<0.000000e+00> : vector<1024x128xf32>
    %2 = tpu.matmul %0, %1, %cst {dimension_numbers = #tpu.dot_dimension_numbers<[1], [0], [0], [1], [0, 0, 1, 1], [], []>} : vector<1024x128xf32>, vector<128x128xf32>, vector<1024x128xf32> -> vector<1024x128xf32>
    %c0_3 = arith.constant 0 : index
    %c0_4 = arith.constant 0 : index
    %3 = vector.load %arg3[%c0_3, %c0_4] : memref<16x128xf32, #tpu.memory_space<vmem>>, vector<1x128xf32>
    %4 = vector.broadcast %3 : vector<1x128xf32> to vector<1024x128xf32>
    %5 = arith.addf %2, %4 : vector<1024x128xf32>
    %cst_5 = arith.constant 0.000000e+00 : f32
    %6 = vector.broadcast %cst_5 : f32 to vector<1024x128xf32>
    %7 = arith.maximumf %5, %6 : vector<1024x128xf32>
    %8 = vector.shape_cast %7 : vector<1024x128xf32> to vector<4x256x128xf32>
    %cst_6 = arith.constant dense<0.000000e+00> : vector<4x128xf32>
    %9 = vector.multi_reduction <add>, %8, %cst_6 [1] : vector<4x256x128xf32> to vector<4x128xf32>
    %cst_7 = arith.constant 2.560000e+02 : f32
    %10 = vector.broadcast %cst_7 : f32 to vector<4x128xf32>
    %11 = arith.divf %9, %10 : vector<4x128xf32>
    %12 = tpu.iota {dimensions = array<i32: 0>} : vector<4x1xi32>
    %c2_i32 = arith.constant 2 : i32
    %13 = vector.broadcast %c2_i32 : i32 to vector<4x1xi32>
    %14 = arith.cmpi slt, %12, %13 : vector<4x1xi32>
    %15 = arith.extui %14 : vector<4x1xi1> to vector<4x1xi32>
    %16 = arith.sitofp %15 : vector<4x1xi32> to vector<4x1xf32>
    %cst_8 = arith.constant 1.000000e+00 : f32
    %17 = vector.broadcast %cst_8 : f32 to vector<4x1xf32>
    %18 = arith.subf %17, %16 : vector<4x1xf32>
    %c0_9 = arith.constant 0 : index
    %c0_10 = arith.constant 0 : index
    %c0_11 = arith.constant 0 : index
    %19 = vector.load %arg2[%c0_9, %c0_10, %c0_11] : memref<5x128x128xf32, #tpu.memory_space<vmem>>, vector<1x128x128xf32>
    %20 = vector.shape_cast %19 : vector<1x128x128xf32> to vector<128x128xf32>
    %cst_12 = arith.constant dense<0.000000e+00> : vector<4x128xf32>
    %21 = tpu.matmul %11, %20, %cst_12 {dimension_numbers = #tpu.dot_dimension_numbers<[1], [0], [0], [1], [0, 0, 1, 1], [], []>} : vector<4x128xf32>, vector<128x128xf32>, vector<4x128xf32> -> vector<4x128xf32>
    %c1 = arith.constant 1 : index
    %c0_13 = arith.constant 0 : index
    %22 = vector.load %arg3[%c1, %c0_13] : memref<16x128xf32, #tpu.memory_space<vmem>>, vector<1x128xf32>
    %23 = vector.broadcast %22 : vector<1x128xf32> to vector<4x128xf32>
    %24 = arith.addf %21, %23 : vector<4x128xf32>
    %25 = vector.broadcast %16 : vector<4x1xf32> to vector<4x128xf32>
    %26 = arith.mulf %24, %25 : vector<4x128xf32>
    %cst_14 = arith.constant dense<0.000000e+00> : vector<128xf32>
    %27 = vector.multi_reduction <add>, %26, %cst_14 [0] : vector<4x128xf32> to vector<128xf32>
    %28 = vector.shape_cast %27 : vector<128xf32> to vector<1x128xf32>
    %cst_15 = arith.constant 5.000000e-01 : f32
    %29 = vector.broadcast %cst_15 : f32 to vector<1x128xf32>
    %30 = arith.mulf %28, %29 : vector<1x128xf32>
    %31 = vector.broadcast %16 : vector<4x1xf32> to vector<4x128xf32>
    %32 = vector.broadcast %30 : vector<1x128xf32> to vector<4x128xf32>
    %33 = arith.mulf %31, %32 : vector<4x128xf32>
    %34 = vector.broadcast %18 : vector<4x1xf32> to vector<4x128xf32>
    %35 = arith.mulf %24, %34 : vector<4x128xf32>
    %cst_16 = arith.constant dense<0.000000e+00> : vector<128xf32>
    %36 = vector.multi_reduction <add>, %35, %cst_16 [0] : vector<4x128xf32> to vector<128xf32>
    %37 = vector.shape_cast %36 : vector<128xf32> to vector<1x128xf32>
    %cst_17 = arith.constant 5.000000e-01 : f32
    %38 = vector.broadcast %cst_17 : f32 to vector<1x128xf32>
    %39 = arith.mulf %37, %38 : vector<1x128xf32>
    %40 = vector.broadcast %18 : vector<4x1xf32> to vector<4x128xf32>
    %41 = vector.broadcast %39 : vector<1x128xf32> to vector<4x128xf32>
    %42 = arith.mulf %40, %41 : vector<4x128xf32>
    %43 = arith.addf %33, %42 : vector<4x128xf32>
    %44 = arith.subf %24, %43 : vector<4x128xf32>
    %45 = arith.mulf %44, %44 : vector<4x128xf32>
    %46 = vector.broadcast %16 : vector<4x1xf32> to vector<4x128xf32>
    %47 = arith.mulf %45, %46 : vector<4x128xf32>
    %cst_18 = arith.constant dense<0.000000e+00> : vector<128xf32>
    %48 = vector.multi_reduction <add>, %47, %cst_18 [0] : vector<4x128xf32> to vector<128xf32>
    %49 = vector.shape_cast %48 : vector<128xf32> to vector<1x128xf32>
    %cst_19 = arith.constant 5.000000e-01 : f32
    %50 = vector.broadcast %cst_19 : f32 to vector<1x128xf32>
    %51 = arith.mulf %49, %50 : vector<1x128xf32>
    %52 = vector.broadcast %16 : vector<4x1xf32> to vector<4x128xf32>
    %53 = vector.broadcast %51 : vector<1x128xf32> to vector<4x128xf32>
    %54 = arith.mulf %52, %53 : vector<4x128xf32>
    %55 = arith.mulf %44, %44 : vector<4x128xf32>
    %56 = vector.broadcast %18 : vector<4x1xf32> to vector<4x128xf32>
    %57 = arith.mulf %55, %56 : vector<4x128xf32>
    %cst_20 = arith.constant dense<0.000000e+00> : vector<128xf32>
    %58 = vector.multi_reduction <add>, %57, %cst_20 [0] : vector<4x128xf32> to vector<128xf32>
    %59 = vector.shape_cast %58 : vector<128xf32> to vector<1x128xf32>
    %cst_21 = arith.constant 5.000000e-01 : f32
    %60 = vector.broadcast %cst_21 : f32 to vector<1x128xf32>
    %61 = arith.mulf %59, %60 : vector<1x128xf32>
    %62 = vector.broadcast %18 : vector<4x1xf32> to vector<4x128xf32>
    %63 = vector.broadcast %61 : vector<1x128xf32> to vector<4x128xf32>
    %64 = arith.mulf %62, %63 : vector<4x128xf32>
    %65 = arith.addf %54, %64 : vector<4x128xf32>
    %c2 = arith.constant 2 : index
    %c0_22 = arith.constant 0 : index
    %66 = vector.load %arg3[%c2, %c0_22] : memref<16x128xf32, #tpu.memory_space<vmem>>, vector<1x128xf32>
    %67 = vector.broadcast %66 : vector<1x128xf32> to vector<4x128xf32>
    %68 = arith.mulf %67, %44 : vector<4x128xf32>
    %cst_23 = arith.constant 9.99999974E-6 : f32
    %69 = vector.broadcast %cst_23 : f32 to vector<4x128xf32>
    %70 = arith.addf %65, %69 : vector<4x128xf32>
    %71 = math.rsqrt %70 : vector<4x128xf32>
    %72 = arith.mulf %68, %71 : vector<4x128xf32>
    %c3 = arith.constant 3 : index
    %c0_24 = arith.constant 0 : index
    %73 = vector.load %arg3[%c3, %c0_24] : memref<16x128xf32, #tpu.memory_space<vmem>>, vector<1x128xf32>
    %74 = vector.broadcast %73 : vector<1x128xf32> to vector<4x128xf32>
    %75 = arith.addf %72, %74 : vector<4x128xf32>
    %cst_25 = arith.constant 0.000000e+00 : f32
    %76 = vector.broadcast %cst_25 : f32 to vector<4x128xf32>
    %77 = arith.maximumf %75, %76 : vector<4x128xf32>
    %c1_26 = arith.constant 1 : index
    %c0_27 = arith.constant 0 : index
    %c0_28 = arith.constant 0 : index
    %78 = vector.load %arg2[%c1_26, %c0_27, %c0_28] : memref<5x128x128xf32, #tpu.memory_space<vmem>>, vector<1x128x128xf32>
    %79 = vector.shape_cast %78 : vector<1x128x128xf32> to vector<128x128xf32>
    %cst_29 = arith.constant dense<0.000000e+00> : vector<4x128xf32>
    %80 = tpu.matmul %77, %79, %cst_29 {dimension_numbers = #tpu.dot_dimension_numbers<[1], [0], [0], [1], [0, 0, 1, 1], [], []>} : vector<4x128xf32>, vector<128x128xf32>, vector<4x128xf32> -> vector<4x128xf32>
    %c4 = arith.constant 4 : index
    %c0_30 = arith.constant 0 : index
    %81 = vector.load %arg3[%c4, %c0_30] : memref<16x128xf32, #tpu.memory_space<vmem>>, vector<1x128xf32>
    %82 = vector.broadcast %81 : vector<1x128xf32> to vector<4x128xf32>
    %83 = arith.addf %80, %82 : vector<4x128xf32>
    %84 = vector.broadcast %16 : vector<4x1xf32> to vector<4x128xf32>
    %85 = arith.mulf %83, %84 : vector<4x128xf32>
    %cst_31 = arith.constant dense<0.000000e+00> : vector<128xf32>
    %86 = vector.multi_reduction <add>, %85, %cst_31 [0] : vector<4x128xf32> to vector<128xf32>
    %87 = vector.shape_cast %86 : vector<128xf32> to vector<1x128xf32>
    %cst_32 = arith.constant 5.000000e-01 : f32
    %88 = vector.broadcast %cst_32 : f32 to vector<1x128xf32>
    %89 = arith.mulf %87, %88 : vector<1x128xf32>
    %90 = vector.broadcast %16 : vector<4x1xf32> to vector<4x128xf32>
    %91 = vector.broadcast %89 : vector<1x128xf32> to vector<4x128xf32>
    %92 = arith.mulf %90, %91 : vector<4x128xf32>
    %93 = vector.broadcast %18 : vector<4x1xf32> to vector<4x128xf32>
    %94 = arith.mulf %83, %93 : vector<4x128xf32>
    %cst_33 = arith.constant dense<0.000000e+00> : vector<128xf32>
    %95 = vector.multi_reduction <add>, %94, %cst_33 [0] : vector<4x128xf32> to vector<128xf32>
    %96 = vector.shape_cast %95 : vector<128xf32> to vector<1x128xf32>
    %cst_34 = arith.constant 5.000000e-01 : f32
    %97 = vector.broadcast %cst_34 : f32 to vector<1x128xf32>
    %98 = arith.mulf %96, %97 : vector<1x128xf32>
    %99 = vector.broadcast %18 : vector<4x1xf32> to vector<4x128xf32>
    %100 = vector.broadcast %98 : vector<1x128xf32> to vector<4x128xf32>
    %101 = arith.mulf %99, %100 : vector<4x128xf32>
    %102 = arith.addf %92, %101 : vector<4x128xf32>
    %103 = arith.subf %83, %102 : vector<4x128xf32>
    %104 = arith.mulf %103, %103 : vector<4x128xf32>
    %105 = vector.broadcast %16 : vector<4x1xf32> to vector<4x128xf32>
    %106 = arith.mulf %104, %105 : vector<4x128xf32>
    %cst_35 = arith.constant dense<0.000000e+00> : vector<128xf32>
    %107 = vector.multi_reduction <add>, %106, %cst_35 [0] : vector<4x128xf32> to vector<128xf32>
    %108 = vector.shape_cast %107 : vector<128xf32> to vector<1x128xf32>
    %cst_36 = arith.constant 5.000000e-01 : f32
    %109 = vector.broadcast %cst_36 : f32 to vector<1x128xf32>
    %110 = arith.mulf %108, %109 : vector<1x128xf32>
    %111 = vector.broadcast %16 : vector<4x1xf32> to vector<4x128xf32>
    %112 = vector.broadcast %110 : vector<1x128xf32> to vector<4x128xf32>
    %113 = arith.mulf %111, %112 : vector<4x128xf32>
    %114 = arith.mulf %103, %103 : vector<4x128xf32>
    %115 = vector.broadcast %18 : vector<4x1xf32> to vector<4x128xf32>
    %116 = arith.mulf %114, %115 : vector<4x128xf32>
    %cst_37 = arith.constant dense<0.000000e+00> : vector<128xf32>
    %117 = vector.multi_reduction <add>, %116, %cst_37 [0] : vector<4x128xf32> to vector<128xf32>
    %118 = vector.shape_cast %117 : vector<128xf32> to vector<1x128xf32>
    %cst_38 = arith.constant 5.000000e-01 : f32
    %119 = vector.broadcast %cst_38 : f32 to vector<1x128xf32>
    %120 = arith.mulf %118, %119 : vector<1x128xf32>
    %121 = vector.broadcast %18 : vector<4x1xf32> to vector<4x128xf32>
    %122 = vector.broadcast %120 : vector<1x128xf32> to vector<4x128xf32>
    %123 = arith.mulf %121, %122 : vector<4x128xf32>
    %124 = arith.addf %113, %123 : vector<4x128xf32>
    %c5 = arith.constant 5 : index
    %c0_39 = arith.constant 0 : index
    %125 = vector.load %arg3[%c5, %c0_39] : memref<16x128xf32, #tpu.memory_space<vmem>>, vector<1x128xf32>
    %126 = vector.broadcast %125 : vector<1x128xf32> to vector<4x128xf32>
    %127 = arith.mulf %126, %103 : vector<4x128xf32>
    %cst_40 = arith.constant 9.99999974E-6 : f32
    %128 = vector.broadcast %cst_40 : f32 to vector<4x128xf32>
    %129 = arith.addf %124, %128 : vector<4x128xf32>
    %130 = math.rsqrt %129 : vector<4x128xf32>
    %131 = arith.mulf %127, %130 : vector<4x128xf32>
    %c6 = arith.constant 6 : index
    %c0_41 = arith.constant 0 : index
    %132 = vector.load %arg3[%c6, %c0_41] : memref<16x128xf32, #tpu.memory_space<vmem>>, vector<1x128xf32>
    %133 = vector.broadcast %132 : vector<1x128xf32> to vector<4x128xf32>
    %134 = arith.addf %131, %133 : vector<4x128xf32>
    %cst_42 = arith.constant 0.000000e+00 : f32
    %135 = vector.broadcast %cst_42 : f32 to vector<4x128xf32>
    %136 = arith.maximumf %134, %135 : vector<4x128xf32>
    %c2_43 = arith.constant 2 : index
    %c0_44 = arith.constant 0 : index
    %c0_45 = arith.constant 0 : index
    %137 = vector.load %arg2[%c2_43, %c0_44, %c0_45] : memref<5x128x128xf32, #tpu.memory_space<vmem>>, vector<1x128x128xf32>
    %138 = vector.shape_cast %137 : vector<1x128x128xf32> to vector<128x128xf32>
    %cst_46 = arith.constant dense<0.000000e+00> : vector<4x128xf32>
    %139 = tpu.matmul %136, %138, %cst_46 {dimension_numbers = #tpu.dot_dimension_numbers<[1], [0], [0], [1], [0, 0, 1, 1], [], []>} : vector<4x128xf32>, vector<128x128xf32>, vector<4x128xf32> -> vector<4x128xf32>
    %c7 = arith.constant 7 : index
    %c0_47 = arith.constant 0 : index
    %140 = vector.load %arg3[%c7, %c0_47] : memref<16x128xf32, #tpu.memory_space<vmem>>, vector<1x128xf32>
    %141 = vector.broadcast %140 : vector<1x128xf32> to vector<4x128xf32>
    %142 = arith.addf %139, %141 : vector<4x128xf32>
    %143 = vector.broadcast %16 : vector<4x1xf32> to vector<4x128xf32>
    %144 = arith.mulf %142, %143 : vector<4x128xf32>
    %cst_48 = arith.constant dense<0.000000e+00> : vector<128xf32>
    %145 = vector.multi_reduction <add>, %144, %cst_48 [0] : vector<4x128xf32> to vector<128xf32>
    %146 = vector.shape_cast %145 : vector<128xf32> to vector<1x128xf32>
    %cst_49 = arith.constant 5.000000e-01 : f32
    %147 = vector.broadcast %cst_49 : f32 to vector<1x128xf32>
    %148 = arith.mulf %146, %147 : vector<1x128xf32>
    %149 = vector.broadcast %16 : vector<4x1xf32> to vector<4x128xf32>
    %150 = vector.broadcast %148 : vector<1x128xf32> to vector<4x128xf32>
    %151 = arith.mulf %149, %150 : vector<4x128xf32>
    %152 = vector.broadcast %18 : vector<4x1xf32> to vector<4x128xf32>
    %153 = arith.mulf %142, %152 : vector<4x128xf32>
    %cst_50 = arith.constant dense<0.000000e+00> : vector<128xf32>
    %154 = vector.multi_reduction <add>, %153, %cst_50 [0] : vector<4x128xf32> to vector<128xf32>
    %155 = vector.shape_cast %154 : vector<128xf32> to vector<1x128xf32>
    %cst_51 = arith.constant 5.000000e-01 : f32
    %156 = vector.broadcast %cst_51 : f32 to vector<1x128xf32>
    %157 = arith.mulf %155, %156 : vector<1x128xf32>
    %158 = vector.broadcast %18 : vector<4x1xf32> to vector<4x128xf32>
    %159 = vector.broadcast %157 : vector<1x128xf32> to vector<4x128xf32>
    %160 = arith.mulf %158, %159 : vector<4x128xf32>
    %161 = arith.addf %151, %160 : vector<4x128xf32>
    %162 = arith.subf %142, %161 : vector<4x128xf32>
    %163 = arith.mulf %162, %162 : vector<4x128xf32>
    %164 = vector.broadcast %16 : vector<4x1xf32> to vector<4x128xf32>
    %165 = arith.mulf %163, %164 : vector<4x128xf32>
    %cst_52 = arith.constant dense<0.000000e+00> : vector<128xf32>
    %166 = vector.multi_reduction <add>, %165, %cst_52 [0] : vector<4x128xf32> to vector<128xf32>
    %167 = vector.shape_cast %166 : vector<128xf32> to vector<1x128xf32>
    %cst_53 = arith.constant 5.000000e-01 : f32
    %168 = vector.broadcast %cst_53 : f32 to vector<1x128xf32>
    %169 = arith.mulf %167, %168 : vector<1x128xf32>
    %170 = vector.broadcast %16 : vector<4x1xf32> to vector<4x128xf32>
    %171 = vector.broadcast %169 : vector<1x128xf32> to vector<4x128xf32>
    %172 = arith.mulf %170, %171 : vector<4x128xf32>
    %173 = arith.mulf %162, %162 : vector<4x128xf32>
    %174 = vector.broadcast %18 : vector<4x1xf32> to vector<4x128xf32>
    %175 = arith.mulf %173, %174 : vector<4x128xf32>
    %cst_54 = arith.constant dense<0.000000e+00> : vector<128xf32>
    %176 = vector.multi_reduction <add>, %175, %cst_54 [0] : vector<4x128xf32> to vector<128xf32>
    %177 = vector.shape_cast %176 : vector<128xf32> to vector<1x128xf32>
    %cst_55 = arith.constant 5.000000e-01 : f32
    %178 = vector.broadcast %cst_55 : f32 to vector<1x128xf32>
    %179 = arith.mulf %177, %178 : vector<1x128xf32>
    %180 = vector.broadcast %18 : vector<4x1xf32> to vector<4x128xf32>
    %181 = vector.broadcast %179 : vector<1x128xf32> to vector<4x128xf32>
    %182 = arith.mulf %180, %181 : vector<4x128xf32>
    %183 = arith.addf %172, %182 : vector<4x128xf32>
    %c8 = arith.constant 8 : index
    %c0_56 = arith.constant 0 : index
    %184 = vector.load %arg3[%c8, %c0_56] : memref<16x128xf32, #tpu.memory_space<vmem>>, vector<1x128xf32>
    %185 = vector.broadcast %184 : vector<1x128xf32> to vector<4x128xf32>
    %186 = arith.mulf %185, %162 : vector<4x128xf32>
    %cst_57 = arith.constant 9.99999974E-6 : f32
    %187 = vector.broadcast %cst_57 : f32 to vector<4x128xf32>
    %188 = arith.addf %183, %187 : vector<4x128xf32>
    %189 = math.rsqrt %188 : vector<4x128xf32>
    %190 = arith.mulf %186, %189 : vector<4x128xf32>
    %c9 = arith.constant 9 : index
    %c0_58 = arith.constant 0 : index
    %191 = vector.load %arg3[%c9, %c0_58] : memref<16x128xf32, #tpu.memory_space<vmem>>, vector<1x128xf32>
    %192 = vector.broadcast %191 : vector<1x128xf32> to vector<4x128xf32>
    %193 = arith.addf %190, %192 : vector<4x128xf32>
    %c3_59 = arith.constant 3 : index
    %c0_60 = arith.constant 0 : index
    %c0_61 = arith.constant 0 : index
    %194 = vector.load %arg2[%c3_59, %c0_60, %c0_61] : memref<5x128x128xf32, #tpu.memory_space<vmem>>, vector<1x128x128xf32>
    %195 = vector.shape_cast %194 : vector<1x128x128xf32> to vector<128x128xf32>
    %cst_62 = arith.constant dense<0.000000e+00> : vector<4x128xf32>
    %196 = tpu.matmul %193, %195, %cst_62 {dimension_numbers = #tpu.dot_dimension_numbers<[1], [0], [0], [1], [0, 0, 1, 1], [], []>} : vector<4x128xf32>, vector<128x128xf32>, vector<4x128xf32> -> vector<4x128xf32>
    %c10 = arith.constant 10 : index
    %c0_63 = arith.constant 0 : index
    %197 = vector.load %arg3[%c10, %c0_63] : memref<16x128xf32, #tpu.memory_space<vmem>>, vector<1x128xf32>
    %198 = vector.broadcast %197 : vector<1x128xf32> to vector<4x128xf32>
    %199 = arith.addf %196, %198 : vector<4x128xf32>
    %200 = vector.broadcast %16 : vector<4x1xf32> to vector<4x128xf32>
    %201 = arith.mulf %199, %200 : vector<4x128xf32>
    %cst_64 = arith.constant dense<0.000000e+00> : vector<128xf32>
    %202 = vector.multi_reduction <add>, %201, %cst_64 [0] : vector<4x128xf32> to vector<128xf32>
    %203 = vector.shape_cast %202 : vector<128xf32> to vector<1x128xf32>
    %cst_65 = arith.constant 5.000000e-01 : f32
    %204 = vector.broadcast %cst_65 : f32 to vector<1x128xf32>
    %205 = arith.mulf %203, %204 : vector<1x128xf32>
    %206 = vector.broadcast %16 : vector<4x1xf32> to vector<4x128xf32>
    %207 = vector.broadcast %205 : vector<1x128xf32> to vector<4x128xf32>
    %208 = arith.mulf %206, %207 : vector<4x128xf32>
    %209 = vector.broadcast %18 : vector<4x1xf32> to vector<4x128xf32>
    %210 = arith.mulf %199, %209 : vector<4x128xf32>
    %cst_66 = arith.constant dense<0.000000e+00> : vector<128xf32>
    %211 = vector.multi_reduction <add>, %210, %cst_66 [0] : vector<4x128xf32> to vector<128xf32>
    %212 = vector.shape_cast %211 : vector<128xf32> to vector<1x128xf32>
    %cst_67 = arith.constant 5.000000e-01 : f32
    %213 = vector.broadcast %cst_67 : f32 to vector<1x128xf32>
    %214 = arith.mulf %212, %213 : vector<1x128xf32>
    %215 = vector.broadcast %18 : vector<4x1xf32> to vector<4x128xf32>
    %216 = vector.broadcast %214 : vector<1x128xf32> to vector<4x128xf32>
    %217 = arith.mulf %215, %216 : vector<4x128xf32>
    %218 = arith.addf %208, %217 : vector<4x128xf32>
    %219 = arith.subf %199, %218 : vector<4x128xf32>
    %220 = arith.mulf %219, %219 : vector<4x128xf32>
    %221 = vector.broadcast %16 : vector<4x1xf32> to vector<4x128xf32>
    %222 = arith.mulf %220, %221 : vector<4x128xf32>
    %cst_68 = arith.constant dense<0.000000e+00> : vector<128xf32>
    %223 = vector.multi_reduction <add>, %222, %cst_68 [0] : vector<4x128xf32> to vector<128xf32>
    %224 = vector.shape_cast %223 : vector<128xf32> to vector<1x128xf32>
    %cst_69 = arith.constant 5.000000e-01 : f32
    %225 = vector.broadcast %cst_69 : f32 to vector<1x128xf32>
    %226 = arith.mulf %224, %225 : vector<1x128xf32>
    %227 = vector.broadcast %16 : vector<4x1xf32> to vector<4x128xf32>
    %228 = vector.broadcast %226 : vector<1x128xf32> to vector<4x128xf32>
    %229 = arith.mulf %227, %228 : vector<4x128xf32>
    %230 = arith.mulf %219, %219 : vector<4x128xf32>
    %231 = vector.broadcast %18 : vector<4x1xf32> to vector<4x128xf32>
    %232 = arith.mulf %230, %231 : vector<4x128xf32>
    %cst_70 = arith.constant dense<0.000000e+00> : vector<128xf32>
    %233 = vector.multi_reduction <add>, %232, %cst_70 [0] : vector<4x128xf32> to vector<128xf32>
    %234 = vector.shape_cast %233 : vector<128xf32> to vector<1x128xf32>
    %cst_71 = arith.constant 5.000000e-01 : f32
    %235 = vector.broadcast %cst_71 : f32 to vector<1x128xf32>
    %236 = arith.mulf %234, %235 : vector<1x128xf32>
    %237 = vector.broadcast %18 : vector<4x1xf32> to vector<4x128xf32>
    %238 = vector.broadcast %236 : vector<1x128xf32> to vector<4x128xf32>
    %239 = arith.mulf %237, %238 : vector<4x128xf32>
    %240 = arith.addf %229, %239 : vector<4x128xf32>
    %c11 = arith.constant 11 : index
    %c0_72 = arith.constant 0 : index
    %241 = vector.load %arg3[%c11, %c0_72] : memref<16x128xf32, #tpu.memory_space<vmem>>, vector<1x128xf32>
    %242 = vector.broadcast %241 : vector<1x128xf32> to vector<4x128xf32>
    %243 = arith.mulf %242, %219 : vector<4x128xf32>
    %cst_73 = arith.constant 9.99999974E-6 : f32
    %244 = vector.broadcast %cst_73 : f32 to vector<4x128xf32>
    %245 = arith.addf %240, %244 : vector<4x128xf32>
    %246 = math.rsqrt %245 : vector<4x128xf32>
    %247 = arith.mulf %243, %246 : vector<4x128xf32>
    %c12 = arith.constant 12 : index
    %c0_74 = arith.constant 0 : index
    %248 = vector.load %arg3[%c12, %c0_74] : memref<16x128xf32, #tpu.memory_space<vmem>>, vector<1x128xf32>
    %249 = vector.broadcast %248 : vector<1x128xf32> to vector<4x128xf32>
    %250 = arith.addf %247, %249 : vector<4x128xf32>
    %cst_75 = arith.constant 0.000000e+00 : f32
    %251 = vector.broadcast %cst_75 : f32 to vector<4x128xf32>
    %252 = arith.maximumf %250, %251 : vector<4x128xf32>
    %c4_76 = arith.constant 4 : index
    %c0_77 = arith.constant 0 : index
    %c0_78 = arith.constant 0 : index
    %253 = vector.load %arg2[%c4_76, %c0_77, %c0_78] : memref<5x128x128xf32, #tpu.memory_space<vmem>>, vector<1x128x128xf32>
    %254 = vector.shape_cast %253 : vector<1x128x128xf32> to vector<128x128xf32>
    %cst_79 = arith.constant dense<0.000000e+00> : vector<4x128xf32>
    %255 = tpu.matmul %252, %254, %cst_79 {dimension_numbers = #tpu.dot_dimension_numbers<[1], [0], [0], [1], [0, 0, 1, 1], [], []>} : vector<4x128xf32>, vector<128x128xf32>, vector<4x128xf32> -> vector<4x128xf32>
    %c13 = arith.constant 13 : index
    %c0_80 = arith.constant 0 : index
    %256 = vector.load %arg3[%c13, %c0_80] : memref<16x128xf32, #tpu.memory_space<vmem>>, vector<1x128xf32>
    %257 = vector.broadcast %256 : vector<1x128xf32> to vector<4x128xf32>
    %258 = arith.addf %255, %257 : vector<4x128xf32>
    %259 = arith.mulf %258, %258 : vector<4x128xf32>
    %cst_81 = arith.constant dense<0.000000e+00> : vector<4xf32>
    %260 = vector.multi_reduction <add>, %259, %cst_81 [1] : vector<4x128xf32> to vector<4xf32>
    %261 = vector.shape_cast %260 : vector<4xf32> to vector<4x1xf32>
    %cst_82 = arith.constant 1.000000e-24 : f32
    %262 = vector.broadcast %cst_82 : f32 to vector<4x1xf32>
    %263 = arith.maximumf %261, %262 : vector<4x1xf32>
    %264 = math.rsqrt %263 : vector<4x1xf32>
    %265 = vector.broadcast %264 : vector<4x1xf32> to vector<4x128xf32>
    %266 = arith.mulf %258, %265 : vector<4x128xf32>
    %267 = arith.mulf %193, %193 : vector<4x128xf32>
    %cst_83 = arith.constant dense<0.000000e+00> : vector<4xf32>
    %268 = vector.multi_reduction <add>, %267, %cst_83 [1] : vector<4x128xf32> to vector<4xf32>
    %269 = vector.shape_cast %268 : vector<4xf32> to vector<4x1xf32>
    %cst_84 = arith.constant 1.000000e-24 : f32
    %270 = vector.broadcast %cst_84 : f32 to vector<4x1xf32>
    %271 = arith.maximumf %269, %270 : vector<4x1xf32>
    %272 = math.rsqrt %271 : vector<4x1xf32>
    %273 = vector.broadcast %272 : vector<4x1xf32> to vector<4x128xf32>
    %274 = arith.mulf %193, %273 : vector<4x128xf32>
    %275 = vector.extract_strided_slice %266 {offsets = [0, 0], sizes = [2, 128], strides = [1, 1]} : vector<4x128xf32> to vector<2x128xf32>
    %276 = vector.extract_strided_slice %266 {offsets = [2, 0], sizes = [2, 128], strides = [1, 1]} : vector<4x128xf32> to vector<2x128xf32>
    %277 = vector.extract_strided_slice %274 {offsets = [0, 0], sizes = [2, 128], strides = [1, 1]} : vector<4x128xf32> to vector<2x128xf32>
    %278 = vector.extract_strided_slice %274 {offsets = [2, 0], sizes = [2, 128], strides = [1, 1]} : vector<4x128xf32> to vector<2x128xf32>
    %279 = arith.mulf %275, %278 : vector<2x128xf32>
    %cst_85 = arith.constant dense<0.000000e+00> : vector<2xf32>
    %280 = vector.multi_reduction <add>, %279, %cst_85 [1] : vector<2x128xf32> to vector<2xf32>
    %281 = vector.shape_cast %280 : vector<2xf32> to vector<2x1xf32>
    %cst_86 = arith.constant dense<0.000000e+00> : vector<1xf32>
    %282 = vector.multi_reduction <add>, %281, %cst_86 [0] : vector<2x1xf32> to vector<1xf32>
    %283 = vector.shape_cast %282 : vector<1xf32> to vector<1x1xf32>
    %cst_87 = arith.constant 2.000000e+00 : f32
    %284 = vector.broadcast %cst_87 : f32 to vector<1x1xf32>
    %285 = arith.divf %283, %284 : vector<1x1xf32>
    %cst_88 = arith.constant -5.000000e-01 : f32
    %286 = vector.broadcast %cst_88 : f32 to vector<1x1xf32>
    %287 = arith.mulf %286, %285 : vector<1x1xf32>
    %288 = arith.mulf %276, %277 : vector<2x128xf32>
    %cst_89 = arith.constant dense<0.000000e+00> : vector<2xf32>
    %289 = vector.multi_reduction <add>, %288, %cst_89 [1] : vector<2x128xf32> to vector<2xf32>
    %290 = vector.shape_cast %289 : vector<2xf32> to vector<2x1xf32>
    %cst_90 = arith.constant dense<0.000000e+00> : vector<1xf32>
    %291 = vector.multi_reduction <add>, %290, %cst_90 [0] : vector<2x1xf32> to vector<1xf32>
    %292 = vector.shape_cast %291 : vector<1xf32> to vector<1x1xf32>
    %cst_91 = arith.constant 2.000000e+00 : f32
    %293 = vector.broadcast %cst_91 : f32 to vector<1x1xf32>
    %294 = arith.divf %292, %293 : vector<1x1xf32>
    %cst_92 = arith.constant -5.000000e-01 : f32
    %295 = vector.broadcast %cst_92 : f32 to vector<1x1xf32>
    %296 = arith.mulf %295, %294 : vector<1x1xf32>
    %297 = tpu.concatenate %287, %296 in 0 : vector<1x1xf32>, vector<1x1xf32> -> vector<2x1xf32>
    %cst_93 = arith.constant 1.000000e+00 : f32
    %298 = vector.broadcast %cst_93 : f32 to vector<2x128xf32>
    %299 = vector.broadcast %297 : vector<2x1xf32> to vector<2x128xf32>
    %300 = arith.mulf %299, %298 : vector<2x128xf32>
    %c0_94 = arith.constant 0 : index
    %c0_95 = arith.constant 0 : index
    %301 = vector.load %arg4[%c0_94, %c0_95] : memref<2x128xf32, #tpu.memory_space<vmem>>, vector<2x128xf32>
    tpu.vector_store %arg4[%c0_94, %c0_95], %300 {strides = array<i32>} : memref<2x128xf32, #tpu.memory_space<vmem>>, vector<2x128xf32>,
    return
  }
}

</mosaic_0001>

<bundles_post_ra>
// kernel: model_forward.1
= control target key start
LH: loop header
LB: loop body
LE: loop exit
PB: predicated region body
PF: predicated region fallthrough
CT: control target
= control target key end

     0   :  { %vm879_vm1 = vcmask 1041409   ;;  %vm881_vm2 = vcmask 1042434   ;;  %vm883_vm3 = vcmask 1043459   ;;  %vm907_vm5 = vcmask 1043456   ;;  %s2731_s1 = inlined_call_operand.vmem [shape: f32[128,128], index: 1, kind: input, shape index: {}]   ;;  %s2732_s0 = inlined_call_operand.vmem [shape: f32[1024,128], index: 0, kind: input, shape index: {}]   ;;  %s2733_s3 = inlined_call_operand.vmem [shape: f32[16,128], index: 3, kind: input, shape index: {}]   ;;  %s2734_s2 = inlined_call_operand.vmem [shape: f32[5,128,128], index: 2, kind: input, shape index: {}]   ;;  %s2735_s4 = inlined_call_operand.vmem [shape: f32[2,128], index: 4, kind: output, shape index: {}]  }
   0x1   :  { %v160_v0 = vld [vmem:[%s2731_s1 + $0x78] sm:$0xff]  ;;  %v159_v1 = vld [vmem:[%s2731_s1 + $0x70] sm:$0xff]  ;;  %v158_v2 = vld [vmem:[%s2731_s1 + $0x68] sm:$0xff] }
   0x2   :  { %163 = vmatpush.msra.mxu0 %v160_v0  ;;  %1466 = vmatpush.msra.mxu1 %v160_v0  ;;  %v157_v3 = vld [vmem:[%s2731_s1 + $0x60] sm:$0xff]  ;;  %v156_v4 = vld [vmem:[%s2731_s1 + $0x58] sm:$0xff]  ;;  %v155_v5 = vld [vmem:[%s2731_s1 + $0x50] sm:$0xff] }
   0x3   :  { %1468 = vmatpush.msra.mxu3 %v160_v0  ;;  %1467 = vmatpush.msra.mxu2 %v160_v0  ;;  %v154_v6 = vld [vmem:[%s2731_s1 + $0x48] sm:$0xff]  ;;  %v153_v7 = vld [vmem:[%s2731_s1 + $0x40] sm:$0xff]  ;;  %v152_v8 = vld [vmem:[%s2731_s1 + $0x38] sm:$0xff] }
   0x4   :  { %164 = vmatpush.msra.mxu0 %v159_v1  ;;  %1469 = vmatpush.msra.mxu1 %v159_v1  ;;  %v151_v9 = vld [vmem:[%s2731_s1 + $0x30] sm:$0xff]  ;;  %v150_v10 = vld [vmem:[%s2731_s1 + $0x28] sm:$0xff]  ;;  %v149_v11 = vld [vmem:[%s2731_s1 + $0x20] sm:$0xff] }
   0x5   :  { %1471 = vmatpush.msra.mxu3 %v159_v1  ;;  %1470 = vmatpush.msra.mxu2 %v159_v1  ;;  %v148_v12 = vld [vmem:[%s2731_s1 + $0x18] sm:$0xff]  ;;  %v147_v13 = vld [vmem:[%s2731_s1 + $0x10] sm:$0xff]  ;;  %v146_v14 = vld [vmem:[%s2731_s1 + $0x8] sm:$0xff] }
   0x6   :  { %165 = vmatpush.msra.mxu0 %v158_v2  ;;  %1472 = vmatpush.msra.mxu1 %v158_v2  ;;  %v145_v15 = vld [vmem:[%s2731_s1] sm:$0xff]  ;;  %v52_v17 = vld [vmem:[%s2732_s0 + $0x118] sm:$0xff]  ;;  %v111_v18 = vld [vmem:[%s2732_s0 + $0x2f0] sm:$0xff] }
   0x7   :  { %1474 = vmatpush.msra.mxu3 %v158_v2  ;;  %1473 = vmatpush.msra.mxu2 %v158_v2  ;;  %v17_v16 = vld [vmem:[%s2732_s0] sm:$0xff]  ;;  %v18_v19 = vld [vmem:[%s2732_s0 + $0x8] sm:$0xff]  ;;  %v112_v21 = vld [vmem:[%s2732_s0 + $0x2f8] sm:$0xff] }
   0x8   :  { %166 = vmatpush.msra.mxu0 %v157_v3  ;;  %1475 = vmatpush.msra.mxu1 %v157_v3  ;;  %v53_v20 = vld [vmem:[%s2732_s0 + $0x120] sm:$0xff]  ;;  %v19_v22 = vld [vmem:[%s2732_s0 + $0x10] sm:$0xff]  ;;  %v54_v23 = vld [vmem:[%s2732_s0 + $0x128] sm:$0xff] }
   0x9   :  { %1477 = vmatpush.msra.mxu3 %v157_v3  ;;  %1476 = vmatpush.msra.mxu2 %v157_v3  ;;  %v113_v24 = vld [vmem:[%s2732_s0 + $0x300] sm:$0xff]  ;;  %v20_v25 = vld [vmem:[%s2732_s0 + $0x18] sm:$0xff]  ;;  %v55_v26 = vld [vmem:[%s2732_s0 + $0x130] sm:$0xff] }
   0xa   :  { %167 = vmatpush.msra.mxu0 %v156_v4  ;;  %1478 = vmatpush.msra.mxu1 %v156_v4  ;;  %v114_v27 = vld [vmem:[%s2732_s0 + $0x308] sm:$0xff]  ;;  %v21_v29 = vld [vmem:[%s2732_s0 + $0x20] sm:$0xff]  ;;  %v56_v30 = vld [vmem:[%s2732_s0 + $0x138] sm:$0xff] }
   0xb   :  { %1480 = vmatpush.msra.mxu3 %v156_v4  ;;  %1479 = vmatpush.msra.mxu2 %v156_v4  ;;  %v82_v28 = vld [vmem:[%s2732_s0 + $0x208] sm:$0xff]  ;;  %v115_v31 = vld [vmem:[%s2732_s0 + $0x310] sm:$0xff]  ;;  %v57_v34 = vld [vmem:[%s2732_s0 + $0x140] sm:$0xff] }
   0xc   :  { %168 = vmatpush.msra.mxu0 %v155_v5  ;;  %1481 = vmatpush.msra.mxu1 %v155_v5  ;;  %v83_v32 = vld [vmem:[%s2732_s0 + $0x210] sm:$0xff]  ;;  %v22_v33 = vld [vmem:[%s2732_s0 + $0x28] sm:$0xff]  ;;  %v116_v35 = vld [vmem:[%s2732_s0 + $0x318] sm:$0xff] }
   0xd   :  { %1483 = vmatpush.msra.mxu3 %v155_v5  ;;  %1482 = vmatpush.msra.mxu2 %v155_v5  ;;  %v84_v36 = vld [vmem:[%s2732_s0 + $0x218] sm:$0xff]  ;;  %v23_v37 = vld [vmem:[%s2732_s0 + $0x30] sm:$0xff]  ;;  %v58_v38 = vld [vmem:[%s2732_s0 + $0x148] sm:$0xff] }
   0xe   :  { %169 = vmatpush.msra.mxu0 %v154_v6  ;;  %1484 = vmatpush.msra.mxu1 %v154_v6  ;;  %v117_v39 = vld [vmem:[%s2732_s0 + $0x320] sm:$0xff]  ;;  %v24_v41 = vld [vmem:[%s2732_s0 + $0x38] sm:$0xff]  ;;  %v59_v42 = vld [vmem:[%s2732_s0 + $0x150] sm:$0xff] }
   0xf   :  { %1486 = vmatpush.msra.mxu3 %v154_v6  ;;  %1485 = vmatpush.msra.mxu2 %v154_v6  ;;  %v85_v40 = vld [vmem:[%s2732_s0 + $0x220] sm:$0xff]  ;;  %v118_v43 = vld [vmem:[%s2732_s0 + $0x328] sm:$0xff]  ;;  %v60_v46 = vld [vmem:[%s2732_s0 + $0x158] sm:$0xff] }
  0x10   :  { %170 = vmatpush.msra.mxu0 %v153_v7  ;;  %1487 = vmatpush.msra.mxu1 %v153_v7  ;;  %v86_v44 = vld [vmem:[%s2732_s0 + $0x228] sm:$0xff]  ;;  %v25_v45 = vld [vmem:[%s2732_s0 + $0x40] sm:$0xff]  ;;  %v119_v47 = vld [vmem:[%s2732_s0 + $0x330] sm:$0xff] }
  0x11   :  { %1489 = vmatpush.msra.mxu3 %v153_v7  ;;  %1488 = vmatpush.msra.mxu2 %v153_v7  ;;  %v87_v48 = vld [vmem:[%s2732_s0 + $0x230] sm:$0xff]  ;;  %v26_v49 = vld [vmem:[%s2732_s0 + $0x48] sm:$0xff]  ;;  %v61_v50 = vld [vmem:[%s2732_s0 + $0x160] sm:$0xff] }
  0x12   :  { %171 = vmatpush.msra.mxu0 %v152_v8  ;;  %1490 = vmatpush.msra.mxu1 %v152_v8  ;;  %v120_v51 = vld [vmem:[%s2732_s0 + $0x338] sm:$0xff]  ;;  %v27_v53 = vld [vmem:[%s2732_s0 + $0x50] sm:$0xff]  ;;  %v62_v54 = vld [vmem:[%s2732_s0 + $0x168] sm:$0xff] }
  0x13   :  { %1492 = vmatpush.msra.mxu3 %v152_v8  ;;  %1491 = vmatpush.msra.mxu2 %v152_v8  ;;  %v88_v52 = vld [vmem:[%s2732_s0 + $0x238] sm:$0xff]  ;;  %v121_v55 = vld [vmem:[%s2732_s0 + $0x340] sm:$0xff]  ;;  %v63_v58 = vld [vmem:[%s2732_s0 + $0x170] sm:$0xff] }
  0x14   :  { %172 = vmatpush.msra.mxu0 %v151_v9  ;;  %1493 = vmatpush.msra.mxu1 %v151_v9  ;;  %v89_v56 = vld [vmem:[%s2732_s0 + $0x240] sm:$0xff]  ;;  %v28_v57 = vld [vmem:[%s2732_s0 + $0x58] sm:$0xff]  ;;  %v122_v59 = vld [vmem:[%s2732_s0 + $0x348] sm:$0xff] }
  0x15   :  { %1495 = vmatpush.msra.mxu3 %v151_v9  ;;  %1494 = vmatpush.msra.mxu2 %v151_v9  ;;  %v90_v60 = vld [vmem:[%s2732_s0 + $0x248] sm:$0xff]  ;;  %v29_v61 = vld [vmem:[%s2732_s0 + $0x60] sm:$0xff]  ;;  %v64_v62 = vld [vmem:[%s2732_s0 + $0x178] sm:$0xff] }
  0x16   :  { %173 = vmatpush.msra.mxu0 %v150_v10  ;;  %1496 = vmatpush.msra.mxu1 %v150_v10  ;;  %v123_v63 = vld [vmem:[%s2732_s0 + $0x350] sm:$0xff]  ;;  %v30_v1 = vld [vmem:[%s2732_s0 + $0x68] sm:$0xff]  ;;  %v65_v2 = vld [vmem:[%s2732_s0 + $0x180] sm:$0xff] }
  0x17   :  { %1498 = vmatpush.msra.mxu3 %v150_v10  ;;  %1497 = vmatpush.msra.mxu2 %v150_v10  ;;  %v91_v0 = vld [vmem:[%s2732_s0 + $0x250] sm:$0xff]  ;;  %v124_v3 = vld [vmem:[%s2732_s0 + $0x358] sm:$0xff]  ;;  %v66_v6 = vld [vmem:[%s2732_s0 + $0x188] sm:$0xff] }
  0x18   :  { %174 = vmatpush.msra.mxu0 %v149_v11  ;;  %1499 = vmatpush.msra.mxu1 %v149_v11  ;;  %v92_v4 = vld [vmem:[%s2732_s0 + $0x258] sm:$0xff]  ;;  %v31_v5 = vld [vmem:[%s2732_s0 + $0x70] sm:$0xff]  ;;  %v125_v7 = vld [vmem:[%s2732_s0 + $0x360] sm:$0xff] }
  0x19   :  { %1501 = vmatpush.msra.mxu3 %v149_v11  ;;  %1500 = vmatpush.msra.mxu2 %v149_v11  ;;  %v93_v8 = vld [vmem:[%s2732_s0 + $0x260] sm:$0xff]  ;;  %v32_v9 = vld [vmem:[%s2732_s0 + $0x78] sm:$0xff]  ;;  %v67_v10 = vld [vmem:[%s2732_s0 + $0x190] sm:$0xff] }
  0x1a   :  { %175 = vmatpush.msra.mxu0 %v148_v12  ;;  %1502 = vmatpush.msra.mxu1 %v148_v12  ;;  %v126_v11 = vld [vmem:[%s2732_s0 + $0x368] sm:$0xff] }
  0x1b   :  { %1504 = vmatpush.msra.mxu3 %v148_v12  ;;  %1503 = vmatpush.msra.mxu2 %v148_v12  ;;  %v94_v12 = vld [vmem:[%s2732_s0 + $0x268] sm:$0xff] }
  0x1c   :  { %176 = vmatpush.msra.mxu0 %v147_v13  ;;  %1505 = vmatpush.msra.mxu1 %v147_v13 }
  0x1d   :  { %1507 = vmatpush.msra.mxu3 %v147_v13  ;;  %1506 = vmatpush.msra.mxu2 %v147_v13 }
  0x1e   :  { %177 = vmatpush.msra.mxu0 %v146_v14  ;;  %1508 = vmatpush.msra.mxu1 %v146_v14 }
  0x1f   :  { %1510 = vmatpush.msra.mxu3 %v146_v14  ;;  %1509 = vmatpush.msra.mxu2 %v146_v14  ;;  %v33_v14 = vld [vmem:[%s2732_s0 + $0x80] sm:$0xff] }
  0x20   :  { %178 = vmatpush.msra.mxu0 %v145_v15  ;;  %1511 = vmatpush.msra.mxu1 %v145_v15 }
  0x21   :  { %1513 = vmatpush.msra.mxu3 %v145_v15  ;;  %179 = vmatmul.f32.vlgmr.msra.gmra.mxu0 %v17_v16  ;;  %v68_v16 = vld [vmem:[%s2732_s0 + $0x198] sm:$0xff] }
  0x22   :  { %284 = vmatmul.f32.vlgmr.msra.gmra.mxu1 %v52_v17  ;;  %461 = vmatmul.f32.vlgmr.msra.gmra.mxu3 %v111_v18  ;;  %v127_v17 = vld [vmem:[%s2732_s0 + $0x370] sm:$0xff] }
  0x23   :  { %1512 = vmatpush.msra.mxu2 %v145_v15  ;;  %v95_v18 = vld [vmem:[%s2732_s0 + $0x270] sm:$0xff] }
  0x24   :  { %374 = vmatmul.f32.vlgmr.msra.gmra.mxu2 %v82_v28  ;;  %v35_v28 = vld [vmem:[%s2732_s0 + $0x90] sm:$0xff] }
  0x29   :  { %182 = vmatmul.f32.gmra.mxu0 %v18_v19 }
  0x2a   :  { %287 = vmatmul.f32.gmra.mxu1 %v53_v20  ;;  %464 = vmatmul.f32.gmra.mxu3 %v112_v21  ;;  %v34_v21 = vld [vmem:[%s2732_s0 + $0x88] sm:$0xff] }
  0x2c   :  { %377 = vmatmul.f32.gmra.mxu2 %v83_v32  ;;  %v97_v32 = vld [vmem:[%s2732_s0 + $0x280] sm:$0xff] }
  0x31   :  { %185 = vmatmul.f32.gmra.mxu0 %v19_v22 }
  0x32   :  { %290 = vmatmul.f32.gmra.mxu1 %v54_v23  ;;  %467 = vmatmul.f32.gmra.mxu3 %v113_v24  ;;  %v69_v23 = vld [vmem:[%s2732_s0 + $0x1a0] sm:$0xff]  ;;  %v128_v24 = vld [vmem:[%s2732_s0 + $0x378] sm:$0xff] }
  0x34   :  { %380 = vmatmul.f32.gmra.mxu2 %v84_v36 }
  0x39   :  { %188 = vmatmul.f32.gmra.mxu0 %v20_v25  ;;  %v96_v25 = vld [vmem:[%s2732_s0 + $0x278] sm:$0xff] }
  0x3a   :  { %293 = vmatmul.f32.gmra.mxu1 %v55_v26  ;;  %470 = vmatmul.f32.gmra.mxu3 %v114_v27 }
  0x3c   :  { %383 = vmatmul.f32.gmra.mxu2 %v85_v40 }
  0x41   :  { %191 = vmatmul.f32.gmra.mxu0 %v21_v29 }
  0x42   :  { %296 = vmatmul.f32.gmra.mxu1 %v56_v30  ;;  %473 = vmatmul.f32.gmra.mxu3 %v115_v31  ;;  %v70_v30 = vld [vmem:[%s2732_s0 + $0x1a8] sm:$0xff]  ;;  %v129_v31 = vld [vmem:[%s2732_s0 + $0x380] sm:$0xff] }
  0x44   :  { %386 = vmatmul.f32.gmra.mxu2 %v86_v44 }
  0x49   :  { %194 = vmatmul.f32.gmra.mxu0 %v22_v33 }
  0x4a   :  { %299 = vmatmul.f32.gmra.mxu1 %v57_v34  ;;  %476 = vmatmul.f32.gmra.mxu3 %v116_v35  ;;  %v36_v35 = vld [vmem:[%s2732_s0 + $0x98] sm:$0xff] }
  0x4c   :  { %389 = vmatmul.f32.gmra.mxu2 %v87_v48  ;;  %v72_v48 = vld [vmem:[%s2732_s0 + $0x1b8] sm:$0xff] }
  0x51   :  { %197 = vmatmul.f32.gmra.mxu0 %v23_v37  ;;  %v71_v37 = vld [vmem:[%s2732_s0 + $0x1b0] sm:$0xff] }
  0x52   :  { %302 = vmatmul.f32.gmra.mxu1 %v58_v38  ;;  %479 = vmatmul.f32.gmra.mxu3 %v117_v39  ;;  %v130_v38 = vld [vmem:[%s2732_s0 + $0x388] sm:$0xff]  ;;  %v1879_v39 = vld [vmem:[%s2733_s3] ss:$0 sm:$0xff] }
  0x54   :  { %392 = vmatmul.f32.gmra.mxu2 %v88_v52 }
  0x59   :  { %200 = vmatmul.f32.gmra.mxu0 %v24_v41  ;;  %v98_v41 = vld [vmem:[%s2732_s0 + $0x288] sm:$0xff] }
  0x5a   :  { %305 = vmatmul.f32.gmra.mxu1 %v59_v42  ;;  %482 = vmatmul.f32.gmra.mxu3 %v118_v43 }
  0x5c   :  { %395 = vmatmul.f32.gmra.mxu2 %v89_v56 }
  0x61   :  { %203 = vmatmul.f32.gmra.mxu0 %v25_v45 }
  0x62   :  { %308 = vmatmul.f32.gmra.mxu1 %v60_v46  ;;  %485 = vmatmul.f32.gmra.mxu3 %v119_v47  ;;  %v37_v46 = vld [vmem:[%s2732_s0 + $0xa0] sm:$0xff] }
  0x64   :  { %398 = vmatmul.f32.gmra.mxu2 %v90_v60  ;;  %v132_v60 = vld [vmem:[%s2732_s0 + $0x398] sm:$0xff] }
  0x69   :  { %206 = vmatmul.f32.gmra.mxu0 %v26_v49  ;;  %v131_v49 = vld [vmem:[%s2732_s0 + $0x390] sm:$0xff] }
  0x6a   :  { %311 = vmatmul.f32.gmra.mxu1 %v61_v50  ;;  %488 = vmatmul.f32.gmra.mxu3 %v120_v51 }
  0x6c   :  { %401 = vmatmul.f32.gmra.mxu2 %v91_v0  ;;  %v100_v0 = vld [vmem:[%s2732_s0 + $0x298] sm:$0xff] }
  0x71   :  { %209 = vmatmul.f32.gmra.mxu0 %v27_v53  ;;  %v99_v53 = vld [vmem:[%s2732_s0 + $0x290] sm:$0xff] }
  0x72   :  { %314 = vmatmul.f32.gmra.mxu1 %v62_v54  ;;  %491 = vmatmul.f32.gmra.mxu3 %v121_v55 }
  0x74   :  { %404 = vmatmul.f32.gmra.mxu2 %v92_v4  ;;  %v39_v4 = vld [vmem:[%s2732_s0 + $0xb0] sm:$0xff] }
  0x79   :  { %212 = vmatmul.f32.gmra.mxu0 %v28_v57  ;;  %v38_v57 = vld [vmem:[%s2732_s0 + $0xa8] sm:$0xff] }
  0x7a   :  { %317 = vmatmul.f32.gmra.mxu1 %v63_v58  ;;  %494 = vmatmul.f32.gmra.mxu3 %v122_v59  ;;  %v73_v59 = vld [vmem:[%s2732_s0 + $0x1c0] sm:$0xff] }
  0x7c   :  { %407 = vmatmul.f32.gmra.mxu2 %v93_v8 }
  0x81   :  { %215 = vmatmul.f32.gmra.mxu0 %v29_v61 }
  0x82   :  { %320 = vmatmul.f32.gmra.mxu1 %v64_v62  ;;  %497 = vmatmul.f32.gmra.mxu3 %v123_v63 }
  0x84   :  { %410 = vmatmul.f32.gmra.mxu2 %v94_v12 }
  0x89   :  { %218 = vmatmul.f32.gmra.mxu0 %v30_v1 }
  0x8a   :  { %323 = vmatmul.f32.gmra.mxu1 %v65_v2  ;;  %500 = vmatmul.f32.gmra.mxu3 %v124_v3 }
  0x8c   :  { %413 = vmatmul.f32.gmra.mxu2 %v95_v18 }
  0x91   :  { %221 = vmatmul.f32.gmra.mxu0 %v31_v5 }
  0x92   :  { %326 = vmatmul.f32.gmra.mxu1 %v66_v6  ;;  %503 = vmatmul.f32.gmra.mxu3 %v125_v7  ;;  %v74_v6 = vld [vmem:[%s2732_s0 + $0x1c8] sm:$0xff]  ;;  %v133_v7 = vld [vmem:[%s2732_s0 + $0x3a0] sm:$0xff] }
  0x94   :  { %416 = vmatmul.f32.gmra.mxu2 %v96_v25 }
  0x99   :  { %224 = vmatmul.f32.gmra.mxu0 %v32_v9 }
  0x9a   :  { %329 = vmatmul.f32.gmra.mxu1 %v67_v10  ;;  %506 = vmatmul.f32.gmra.mxu3 %v126_v11  ;;  %v101_v11 = vld [vmem:[%s2732_s0 + $0x2a0] sm:$0xff] }
  0x9c   :  { %419 = vmatmul.f32.gmra.mxu2 %v97_v32 }
  0x9e   :  { %v1811_v13 = vpop.f32.mrf.mxu0 }
  0x9f   :  { %v1816_v15 = vpop.f32.mrf.mxu1 }
  0xa1   :  { %227 = vmatmul.f32.gmra.mxu0 %v33_v14 }
  0xa2   :  { %332 = vmatmul.f32.gmra.mxu1 %v68_v16  ;;  %509 = vmatmul.f32.gmra.mxu3 %v127_v17  ;;  %v40_v17 = vld [vmem:[%s2732_s0 + $0xb8] sm:$0xff] }
  0xa4   :  { %422 = vmatmul.f32.gmra.mxu2 %v98_v41 }
  0xa5   :  { %v1827_v19 = vpop.f32.mrf.mxu3 }
  0xa6   :  { %v1829_v20 = vpop.f32.mrf.mxu0 }
  0xa7   :  { %v1834_v22 = vpop.f32.mrf.mxu1  ;;  %v1899_v50 = vpop.f32.mrf.mxu2 }
  0xa9   :  { %230 = vmatmul.f32.gmra.mxu0 %v34_v21  ;;  %v75_v21 = vld [vmem:[%s2732_s0 + $0x1d0] sm:$0xff] }
  0xaa   :  { %335 = vmatmul.f32.gmra.mxu1 %v69_v23  ;;  %512 = vmatmul.f32.gmra.mxu3 %v128_v24  ;;  %v134_v23 = vld [vmem:[%s2732_s0 + $0x3a8] sm:$0xff] }
  0xac   :  { %425 = vmatmul.f32.gmra.mxu2 %v99_v53  ;;  %v181_v53 = vadd.f32 %v1879_v39, %v1811_v13 }
  0xad   :  { %v1845_v26 = vpop.f32.mrf.mxu3 }
  0xae   :  { %v1847_v27 = vpop.f32.mrf.mxu0 }
  0xaf   :  { %v1852_v29 = vpop.f32.mrf.mxu1  ;;  %v1918_v61 = vpop.f32.mrf.mxu2 }
  0xb1   :  { %233 = vmatmul.f32.gmra.mxu0 %v35_v28 }
  0xb2   :  { %338 = vmatmul.f32.gmra.mxu1 %v70_v30  ;;  %515 = vmatmul.f32.gmra.mxu3 %v129_v31  ;;  %v102_v30 = vld [vmem:[%s2732_s0 + $0x2a8] sm:$0xff] }
  0xb4   :  { %428 = vmatmul.f32.gmra.mxu2 %v100_v0 }
  0xb5   :  { %v468_v33 = vpop.f32.mrf.mxu3 }
  0xb6   :  { %v1863_v34 = vpop.f32.mrf.mxu0  ;;  %v469_v40 = vadd.f32 %v1879_v39, %v468_v33 }
  0xb7   :  { %v1868_v36 = vpop.f32.mrf.mxu1  ;;  %v1937_v8 = vpop.f32.mrf.mxu2  ;;  %v190_v13 = vadd.f32 %v1879_v39, %v1863_v34 }
  0xb8   :  { %v660_v43 = vmax.f32 %v469_v40, 0.0  ;;  %v135_v40 = vld [vmem:[%s2732_s0 + $0x3b0] sm:$0xff] }
  0xb9   :  { %236 = vmatmul.f32.gmra.mxu0 %v36_v35  ;;  %v41_v35 = vld [vmem:[%s2732_s0 + $0xc0] sm:$0xff] }
  0xba   :  { %341 = vmatmul.f32.gmra.mxu1 %v71_v37  ;;  %518 = vmatmul.f32.gmra.mxu3 %v130_v38  ;;  %v76_v38 = vld [vmem:[%s2732_s0 + $0x1d8] sm:$0xff] }
  0xbc   :  { %431 = vmatmul.f32.gmra.mxu2 %v101_v11  ;;  %v43_v11 = vld [vmem:[%s2732_s0 + $0xd0] sm:$0xff] }
  0xbd   :  { %v471_v42 = vpop.f32.mrf.mxu3 }
  0xbe   :  { %v472_v44 = vadd.f32 %v1879_v39, %v471_v42  ;;  %v1886_v45 = vpop.f32.mrf.mxu0 }
  0xbf   :  { %v1891_v47 = vpop.f32.mrf.mxu1  ;;  %v1956_v24 = vpop.f32.mrf.mxu2 }
  0xc0   :  { %v661_v51 = vmax.f32 %v472_v44, 0.0  ;;  %v103_v44 = vld [vmem:[%s2732_s0 + $0x2b0] sm:$0xff] }
  0xc1   :  { %239 = vmatmul.f32.gmra.mxu0 %v37_v46  ;;  %v184_v46 = vadd.f32 %v1879_v39, %v1829_v20  ;;  %v77_v20 = vld [vmem:[%s2732_s0 + $0x1e0] sm:$0xff] }
  0xc2   :  { %v803_v52 = vadd.f32 %v661_v51, %v660_v43  ;;  %344 = vmatmul.f32.gmra.mxu1 %v72_v48  ;;  %521 = vmatmul.f32.gmra.mxu3 %v131_v49 }
  0xc4   :  { %434 = vmatmul.f32.gmra.mxu2 %v102_v30 }
  0xc5   :  { %v474_v54 = vpop.f32.mrf.mxu3 }
  0xc6   :  { %v475_v55 = vadd.f32 %v1879_v39, %v474_v54  ;;  %v1905_v56 = vpop.f32.mrf.mxu0  ;;  %v187_v54 = vadd.f32 %v1879_v39, %v1847_v27  ;;  %v564_v27 = vmax.f32 %v181_v53, 0.0 }
  0xc7   :  { %v1910_v58 = vpop.f32.mrf.mxu1  ;;  %v1973_v41 = vpop.f32.mrf.mxu2 }
  0xc8   :  { %v662_v62 = vmax.f32 %v475_v55, 0.0  ;;  %v566_v0 = vmax.f32 %v187_v54, 0.0 }
  0xc9   :  { %242 = vmatmul.f32.gmra.mxu0 %v38_v57  ;;  %v136_v57 = vld [vmem:[%s2732_s0 + $0x3b8] sm:$0xff] }
  0xca   :  { %v804_v63 = vadd.f32 %v803_v52, %v662_v62  ;;  %347 = vmatmul.f32.gmra.mxu1 %v73_v59  ;;  %524 = vmatmul.f32.gmra.mxu3 %v132_v60  ;;  %v42_v52 = vld [vmem:[%s2732_s0 + $0xc8] sm:$0xff]  ;;  %v565_v62 = vmax.f32 %v184_v46, 0.0 }
  0xcc   :  { %437 = vmatmul.f32.gmra.mxu2 %v103_v44 }
  0xcd   :  { %v477_v1 = vpop.f32.mrf.mxu3 }
  0xce   :  { %v478_v2 = vadd.f32 %v1879_v39, %v477_v1  ;;  %v1924_v3 = vpop.f32.mrf.mxu0  ;;  %v193_v1 = vadd.f32 %v1879_v39, %v1886_v45 }
  0xcf   :  { %v1929_v5 = vpop.f32.mrf.mxu1  ;;  %v1996_v59 = vpop.f32.mrf.mxu2 }
  0xd0   :  { %v663_v9 = vmax.f32 %v478_v2, 0.0  ;;  %v104_v2 = vld [vmem:[%s2732_s0 + $0x2b8] sm:$0xff]  ;;  %v568_v45 = vmax.f32 %v193_v1, 0.0 }
  0xd1   :  { %245 = vmatmul.f32.gmra.mxu0 %v39_v4  ;;  %v692_v4 = vadd.f32 %v565_v62, %v564_v27 }
  0xd2   :  { %v805_v10 = vadd.f32 %v804_v63, %v663_v9  ;;  %350 = vmatmul.f32.gmra.mxu1 %v74_v6  ;;  %527 = vmatmul.f32.gmra.mxu3 %v133_v7  ;;  %v567_v6 = vmax.f32 %v190_v13, 0.0  ;;  %v196_v7 = vadd.f32 %v1879_v39, %v1905_v56  ;;  %v137_v56 = vld [vmem:[%s2732_s0 + $0x3c0] sm:$0xff] }
  0xd4   :  { %440 = vmatmul.f32.gmra.mxu2 %v104_v2  ;;  %v569_v30 = vmax.f32 %v196_v7, 0.0  ;;  %v106_v2 = vld [vmem:[%s2732_s0 + $0x2c8] sm:$0xff] }
  0xd5   :  { %v480_v12 = vpop.f32.mrf.mxu3 }
  0xd6   :  { %v481_v14 = vadd.f32 %v1879_v39, %v480_v12  ;;  %v1943_v16 = vpop.f32.mrf.mxu0  ;;  %v693_v12 = vadd.f32 %v692_v4, %v566_v0 }
  0xd7   :  { %v1948_v18 = vpop.f32.mrf.mxu1 }
  0xd8   :  { %v664_v25 = vmax.f32 %v481_v14, 0.0  ;;  %v199_v14 = vadd.f32 %v1879_v39, %v1924_v3 }
  0xd9   :  { %248 = vmatmul.f32.gmra.mxu0 %v40_v17 }
  0xda   :  { %v806_v28 = vadd.f32 %v805_v10, %v664_v25  ;;  %353 = vmatmul.f32.gmra.mxu1 %v75_v21  ;;  %530 = vmatmul.f32.gmra.mxu3 %v134_v23  ;;  %v78_v21 = vld [vmem:[%s2732_s0 + $0x1e8] sm:$0xff]  ;;  %v2021_v23 = vpop.f32.mrf.mxu2 }
  0xdd   :  { %v483_v31 = vpop.f32.mrf.mxu3 }
  0xde   :  { %v484_v32 = vadd.f32 %v1879_v39, %v483_v31  ;;  %v204_v33 = vpop.f32.mrf.mxu0  ;;  %v202_v31 = vadd.f32 %v1879_v39, %v1943_v16 }
  0xdf   :  { %v1965_v37 = vpop.f32.mrf.mxu1 }
  0xe0   :  { %v665_v42 = vmax.f32 %v484_v32, 0.0  ;;  %v571_v16 = vmax.f32 %v202_v31, 0.0 }
  0xe1   :  { %251 = vmatmul.f32.gmra.mxu0 %v41_v35  ;;  %v570_v35 = vmax.f32 %v199_v14, 0.0 }
  0xe2   :  { %v807_v43 = vadd.f32 %v806_v28, %v665_v42  ;;  %356 = vmatmul.f32.gmra.mxu1 %v76_v38  ;;  %533 = vmatmul.f32.gmra.mxu3 %v135_v40  ;;  %v694_v28 = vadd.f32 %v693_v12, %v567_v6  ;;  %v205_v38 = vadd.f32 %v1879_v39, %v204_v33  ;;  %v872_v40 = vld [vmem:[%s2734_s2 + $0x78] sm:$0xff]  ;;  %v105_v42 = vld [vmem:[%s2732_s0 + $0x2c0] sm:$0xff] }
  0xe3   :  { %886 = vmatpush.msrb.mxu1 %v872_v40  ;;  %443 = vmatmul.f32.gmra.mxu2 %v105_v42  ;;  %v44_v33 = vld [vmem:[%s2732_s0 + $0xd8] sm:$0xff] }
  0xe4   :  { %v695_v32 = vadd.f32 %v694_v28, %v568_v45  ;;  %v572_v53 = vmax.f32 %v205_v38, 0.0  ;;  %v107_v38 = vld [vmem:[%s2732_s0 + $0x2d0] sm:$0xff] }
  0xe5   :  { %v486_v48 = vpop.f32.mrf.mxu3 }
  0xe6   :  { %v487_v49 = vadd.f32 %v1879_v39, %v486_v48  ;;  %v207_v51 = vpop.f32.mrf.mxu0 }
  0xe7   :  { %v1988_v55 = vpop.f32.mrf.mxu1  ;;  %v208_v44 = vadd.f32 %v1879_v39, %v207_v51  ;;  %v138_v51 = vld [vmem:[%s2732_s0 + $0x3c8] sm:$0xff] }
  0xe8   :  { %v666_v60 = vmax.f32 %v487_v49, 0.0 }
  0xe9   :  { %254 = vmatmul.f32.gmra.mxu0 %v42_v52  ;;  %v573_v13 = vmax.f32 %v208_v44, 0.0 }
  0xea   :  { %v808_v63 = vadd.f32 %v807_v43, %v666_v60  ;;  %359 = vmatmul.f32.gmra.mxu1 %v77_v20  ;;  %536 = vmatmul.f32.gmra.mxu3 %v136_v57  ;;  %v696_v43 = vadd.f32 %v695_v32, %v569_v30  ;;  %v79_v57 = vld [vmem:[%s2732_s0 + $0x1f0] sm:$0xff]  ;;  %v2046_v60 = vpop.f32.mrf.mxu2 }
  0xeb   :  { %446 = vmatmul.f32.gmra.mxu2 %v106_v2  ;;  %v141_v2 = vld [vmem:[%s2732_s0 + $0x3e0] sm:$0xff] }
  0xec   :  { %v697_v52 = vadd.f32 %v696_v43, %v570_v35  ;;  %v871_v35 = vld [vmem:[%s2734_s2 + $0x70] sm:$0xff] }
  0xed   :  { %v489_v34 = vpop.f32.mrf.mxu3  ;;  %887 = vmatpush.msrb.mxu1 %v871_v35 }
  0xee   :  { %v490_v9 = vadd.f32 %v1879_v39, %v489_v34  ;;  %v210_v10 = vpop.f32.mrf.mxu0  ;;  %v698_v62 = vadd.f32 %v697_v52, %v571_v16  ;;  %v46_v16 = vld [vmem:[%s2732_s0 + $0xe8] sm:$0xff] }
  0xef   :  { %v2013_v17 = vpop.f32.mrf.mxu1  ;;  %v211_v54 = vadd.f32 %v1879_v39, %v210_v10 }
  0xf0   :  { %v667_v25 = vmax.f32 %v490_v9, 0.0  ;;  %v699_v0 = vadd.f32 %v698_v62, %v572_v53 }
  0xf1   :  { %257 = vmatmul.f32.gmra.mxu0 %v43_v11  ;;  %v574_v1 = vmax.f32 %v211_v54, 0.0  ;;  %v45_v11 = vld [vmem:[%s2732_s0 + $0xe0] sm:$0xff] }
  0xf2   :  { %v809_v3 = vadd.f32 %v808_v63, %v667_v25  ;;  %362 = vmatmul.f32.gmra.mxu1 %v78_v21  ;;  %539 = vmatmul.f32.gmra.mxu3 %v137_v56  ;;  %v700_v4 = vadd.f32 %v699_v0, %v573_v13  ;;  %v80_v21 = vld [vmem:[%s2732_s0 + $0x1f8] sm:$0xff]  ;;  %v139_v56 = vld [vmem:[%s2732_s0 + $0x3d0] sm:$0xff]  ;;  %v2065_v25 = vpop.f32.mrf.mxu2 }
  0xf3   :  { %449 = vmatmul.f32.gmra.mxu2 %v107_v38 }
  0xf4   :  { %v701_v12 = vadd.f32 %v700_v4, %v574_v1 }
  0xf5   :  { %v492_v46 = vpop.f32.mrf.mxu3 }
  0xf6   :  { %v493_v48 = vadd.f32 %v1879_v39, %v492_v46  ;;  %v213_v49 = vpop.f32.mrf.mxu0 }
  0xf7   :  { %v2038_v20 = vpop.f32.mrf.mxu1  ;;  %v214_v63 = vadd.f32 %v1879_v39, %v213_v49  ;;  %v140_v49 = vld [vmem:[%s2732_s0 + $0x3d8] sm:$0xff] }
  0xf8   :  { %v668_v27 = vmax.f32 %v493_v48, 0.0  ;;  %v81_v48 = vld [vmem:[%s2732_s0 + $0x200] sm:$0xff] }
  0xf9   :  { %260 = vmatmul.f32.gmra.mxu0 %v44_v33  ;;  %v575_v6 = vmax.f32 %v214_v63, 0.0 }
  0xfa   :  { %365 = vmatmul.f32.gmra.mxu1 %v79_v57  ;;  %542 = vmatmul.f32.gmra.mxu3 %v138_v51  ;;  %v810_v34 = vadd.f32 %v809_v3, %v668_v27  ;;  %v2086_v33 = vpop.f32.mrf.mxu2  ;;  %v108_v51 = vld [vmem:[%s2732_s0 + $0x2d8] sm:$0xff]  ;;  %v47_v27 = vld [vmem:[%s2732_s0 + $0xf0] sm:$0xff] }
  0xfb   :  { %v702_v30 = vadd.f32 %v701_v12, %v575_v6  ;;  %452 = vmatmul.f32.gmra.mxu2 %v108_v51 }
  0xfd   :  { %v495_v7 = vpop.f32.mrf.mxu3 }
  0xfe   :  { %v496_v9 = vadd.f32 %v1879_v39, %v495_v7  ;;  %v216_v10 = vpop.f32.mrf.mxu0 }
  0xff   :  { %v217_v45 = vadd.f32 %v1879_v39, %v216_v10  ;;  %v2057_v14 = vpop.f32.mrf.mxu1  ;;  %v870_v10 = vld [vmem:[%s2734_s2 + $0x68] sm:$0xff] }
 0x100   :  { %v669_v28 = vmax.f32 %v496_v9, 0.0  ;;  %888 = vmatpush.msrb.mxu1 %v870_v10 }
 0x101   :  { %v576_v31 = vmax.f32 %v217_v45, 0.0  ;;  %263 = vmatmul.f32.gmra.mxu0 %v45_v11  ;;  %v109_v11 = vld [vmem:[%s2732_s0 + $0x2e0] sm:$0xff] }
 0x102   :  { %v811_v3 = vadd.f32 %v810_v34, %v669_v28  ;;  %368 = vmatmul.f32.gmra.mxu1 %v80_v21  ;;  %545 = vmatmul.f32.gmra.mxu3 %v139_v56  ;;  %v2101_v4 = vpop.f32.mrf.mxu2  ;;  %v48_v56 = vld [vmem:[%s2732_s0 + $0xf8] sm:$0xff] }
 0x103   :  { %v703_v32 = vadd.f32 %v702_v30, %v576_v31  ;;  %455 = vmatmul.f32.gmra.mxu2 %v109_v11  ;;  %v142_v31 = vld [vmem:[%s2732_s0 + $0x3e8] sm:$0xff] }
 0x105   :  { %v498_v40 = vpop.f32.mrf.mxu3 }
 0x106   :  { %v499_v42 = vadd.f32 %v1879_v39, %v498_v40  ;;  %v219_v43 = vpop.f32.mrf.mxu0 }
 0x107   :  { %v220_v44 = vadd.f32 %v1879_v39, %v219_v43  ;;  %v2078_v46 = vpop.f32.mrf.mxu1 }
 0x108   :  { %v670_v52 = vmax.f32 %v499_v42, 0.0  ;;  %v110_v42 = vld [vmem:[%s2732_s0 + $0x2e8] sm:$0xff] }
 0x109   :  { %v577_v53 = vmax.f32 %v220_v44, 0.0  ;;  %266 = vmatmul.f32.gmra.mxu0 %v46_v16 }
 0x10a   :  { %v812_v54 = vadd.f32 %v811_v3, %v670_v52  ;;  %371 = vmatmul.f32.gmra.mxu1 %v81_v48  ;;  %548 = vmatmul.f32.gmra.mxu3 %v140_v49  ;;  %v2119_v3 = vpop.f32.mrf.mxu2  ;;  %v49_v48 = vld [vmem:[%s2732_s0 + $0x100] sm:$0xff] }
 0x10b   :  { %v704_v57 = vadd.f32 %v703_v32, %v577_v53  ;;  %458 = vmatmul.f32.gmra.mxu2 %v110_v42  ;;  %v143_v53 = vld [vmem:[%s2732_s0 + $0x3f0] sm:$0xff] }
 0x10d   :  { %v501_v62 = vpop.f32.mrf.mxu3 }
 0x10e   :  { %v502_v13 = vadd.f32 %v1879_v39, %v501_v62  ;;  %v222_v63 = vpop.f32.mrf.mxu0 }
 0x10f   :  { %v223_v0 = vadd.f32 %v1879_v39, %v222_v63  ;;  %v2096_v1 = vpop.f32.mrf.mxu1 }
 0x110   :  { %v671_v6 = vmax.f32 %v502_v13, 0.0  ;;  %v869_v13 = vld [vmem:[%s2734_s2 + $0x60] sm:$0xff] }
 0x111   :  { %v578_v7 = vmax.f32 %v223_v0, 0.0  ;;  %269 = vmatmul.f32.gmra.mxu0 %v47_v27  ;;  %889 = vmatpush.msrb.mxu1 %v869_v13 }
 0x112   :  { %v813_v34 = vadd.f32 %v812_v54, %v671_v6  ;;  %551 = vmatmul.f32.gmra.mxu3 %v141_v2  ;;  %v2134_v54 = vpop.f32.mrf.mxu2  ;;  %v50_v6 = vld [vmem:[%s2732_s0 + $0x108] sm:$0xff] }
 0x113   :  { %v705_v9 = vadd.f32 %v704_v57, %v578_v7 }
 0x115   :  { %v504_v12 = vpop.f32.mrf.mxu3 }
 0x116   :  { %v505_v45 = vadd.f32 %v1879_v39, %v504_v12  ;;  %v225_v21 = vpop.f32.mrf.mxu0 }
 0x117   :  { %v226_v28 = vadd.f32 %v1879_v39, %v225_v21  ;;  %v2114_v30 = vpop.f32.mrf.mxu1 }
 0x118   :  { %v672_v32 = vmax.f32 %v505_v45, 0.0 }
 0x119   :  { %v579_v35 = vmax.f32 %v226_v28, 0.0  ;;  %272 = vmatmul.f32.gmra.mxu0 %v48_v56 }
 0x11a   :  { %v814_v38 = vadd.f32 %v813_v34, %v672_v32  ;;  %554 = vmatmul.f32.gmra.mxu3 %v142_v31  ;;  %v2149_v10 = vpop.f32.mrf.mxu2  ;;  %v51_v32 = vld [vmem:[%s2732_s0 + $0x110] sm:$0xff] }
 0x11b   :  { %v706_v40 = vadd.f32 %v705_v9, %v579_v35  ;;  %v144_v9 = vld [vmem:[%s2732_s0 + $0x3f8] sm:$0xff] }
 0x11d   :  { %v507_v43 = vpop.f32.mrf.mxu3 }
 0x11e   :  { %v508_v16 = vadd.f32 %v1879_v39, %v507_v43  ;;  %v228_v44 = vpop.f32.mrf.mxu0 }
 0x11f   :  { %v229_v49 = vadd.f32 %v1879_v39, %v228_v44  ;;  %v2129_v52 = vpop.f32.mrf.mxu1  ;;  %v868_v44 = vld [vmem:[%s2734_s2 + $0x58] sm:$0xff] }
 0x120   :  { %v673_v57 = vmax.f32 %v508_v16, 0.0  ;;  %890 = vmatpush.msrb.mxu1 %v868_v44 }
 0x121   :  { %v580_v51 = vmax.f32 %v229_v49, 0.0  ;;  %275 = vmatmul.f32.gmra.mxu0 %v49_v48 }
 0x122   :  { %v815_v62 = vadd.f32 %v814_v38, %v673_v57  ;;  %557 = vmatmul.f32.gmra.mxu3 %v143_v53 }
 0x123   :  { %v707_v63 = vadd.f32 %v706_v40, %v580_v51  ;;  %v2158_v40 = vpop.f32.mrf.mxu2 }
 0x125   :  { %v510_v27 = vpop.f32.mrf.mxu3 }
 0x126   :  { %v511_v0 = vadd.f32 %v1879_v39, %v510_v27  ;;  %v231_v2 = vpop.f32.mrf.mxu0 }
 0x127   :  { %v232_v7 = vadd.f32 %v1879_v39, %v231_v2  ;;  %v2144_v34 = vpop.f32.mrf.mxu1 }
 0x128   :  { %2736 = vst [vmem:[#allocation2_spill] sm:$0xff] %v2144_v34  ;;  %v674_v11 = vmax.f32 %v511_v0, 0.0 }
 0x129   :  { %v581_v12 = vmax.f32 %v232_v7, 0.0  ;;  %278 = vmatmul.f32.gmra.mxu0 %v50_v6  ;;  %v867_v6 = vld [vmem:[%s2734_s2 + $0x50] sm:$0xff] }
 0x12a   :  { %v816_v45 = vadd.f32 %v815_v62, %v674_v11  ;;  %560 = vmatmul.f32.gmra.mxu3 %v144_v9  ;;  %891 = vmatpush.msrb.mxu1 %v867_v6 }
 0x12b   :  { %v708_v21 = vadd.f32 %v707_v63, %v581_v12  ;;  %v2167_v13 = vpop.f32.mrf.mxu2 }
 0x12d   :  { %v513_v56 = vpop.f32.mrf.mxu3 }
 0x12e   :  { %v514_v28 = vadd.f32 %v1879_v39, %v513_v56  ;;  %v234_v31 = vpop.f32.mrf.mxu0 }
 0x12f   :  { %v235_v35 = vadd.f32 %v1879_v39, %v234_v31  ;;  %v2156_v38 = vpop.f32.mrf.mxu1 }
 0x130   :  { %2737 = vst [vmem:[#allocation3_spill] sm:$0xff] %v2156_v38  ;;  %v675_v42 = vmax.f32 %v514_v28, 0.0  ;;  %v388_v38 = vadd.f32 %v1879_v39, %v1973_v41 }
 0x131   :  { %v582_v43 = vmax.f32 %v235_v35, 0.0  ;;  %281 = vmatmul.f32.gmra.mxu0 %v51_v32 }
 0x132   :  { %v817_v16 = vadd.f32 %v816_v45, %v675_v42 }
 0x133   :  { %v709_v48 = vadd.f32 %v708_v21, %v582_v43  ;;  %v2176_v28 = vpop.f32.mrf.mxu2 }
 0x135   :  { %v516_v49 = vpop.f32.mrf.mxu3 }
 0x136   :  { %v517_v53 = vadd.f32 %v1879_v39, %v516_v49  ;;  %v237_v57 = vpop.f32.mrf.mxu0 }
 0x137   :  { %v238_v51 = vadd.f32 %v1879_v39, %v237_v57  ;;  %v2165_v62 = vpop.f32.mrf.mxu1 }
 0x138   :  { %2738 = vst [vmem:[#allocation4_spill] sm:$0xff] %v2165_v62  ;;  %v676_v63 = vmax.f32 %v517_v53, 0.0 }
 0x139   :  { %v583_v27 = vmax.f32 %v238_v51, 0.0 }
 0x13a   :  { %v818_v0 = vadd.f32 %v817_v16, %v676_v63  ;;  %v866_v63 = vld [vmem:[%s2734_s2 + $0x48] sm:$0xff] }
 0x13b   :  { %v710_v2 = vadd.f32 %v709_v48, %v583_v27  ;;  %v2182_v51 = vpop.f32.mrf.mxu2  ;;  %892 = vmatpush.msrb.mxu1 %v866_v63 }
 0x13d   :  { %v519_v7 = vpop.f32.mrf.mxu3 }
 0x13e   :  { %v520_v9 = vadd.f32 %v1879_v39, %v519_v7  ;;  %v240_v11 = vpop.f32.mrf.mxu0 }
 0x13f   :  { %v241_v12 = vadd.f32 %v1879_v39, %v240_v11  ;;  %v2174_v45 = vpop.f32.mrf.mxu1 }
 0x140   :  { %2739 = vst [vmem:[#allocation5_spill] sm:$0xff] %v2174_v45  ;;  %v677_v21 = vmax.f32 %v520_v9, 0.0  ;;  %v385_v45 = vadd.f32 %v1879_v39, %v1956_v24  ;;  %v633_v24 = vmax.f32 %v388_v38, 0.0 }
 0x141   :  { %v584_v56 = vmax.f32 %v241_v12, 0.0 }
 0x142   :  { %v819_v31 = vadd.f32 %v818_v0, %v677_v21 }
 0x143   :  { %v711_v32 = vadd.f32 %v710_v2, %v584_v56 }
 0x145   :  { %v522_v35 = vpop.f32.mrf.mxu3 }
 0x146   :  { %v523_v42 = vadd.f32 %v1879_v39, %v522_v35  ;;  %v243_v43 = vpop.f32.mrf.mxu0 }
 0x147   :  { %v244_v16 = vadd.f32 %v1879_v39, %v243_v43  ;;  %v2180_v44 = vpop.f32.mrf.mxu1 }
 0x148   :  { %2740 = vst [vmem:[#allocation6_spill] sm:$0xff] %v2180_v44  ;;  %v678_v48 = vmax.f32 %v523_v42, 0.0 }
 0x149   :  { %v585_v49 = vmax.f32 %v244_v16, 0.0 }
 0x14a   :  { %v820_v53 = vadd.f32 %v819_v31, %v678_v48  ;;  %v2191_v31 = vpop.f32.mrf.mxu2 }
 0x14b   :  { %v712_v57 = vadd.f32 %v711_v32, %v585_v49 }
 0x14d   :  { %v525_v27 = vpop.f32.mrf.mxu3 }
 0x14e   :  { %v526_v0 = vadd.f32 %v1879_v39, %v525_v27  ;;  %v246_v2 = vpop.f32.mrf.mxu0 }
 0x14f   :  { %v247_v6 = vadd.f32 %v1879_v39, %v246_v2  ;;  %v2189_v7 = vpop.f32.mrf.mxu1 }
 0x150   :  { %2741 = vst [vmem:[#allocation7_spill] sm:$0xff] %v2189_v7  ;;  %v679_v9 = vmax.f32 %v526_v0, 0.0 }
 0x151   :  { %v586_v11 = vmax.f32 %v247_v6, 0.0 }
 0x152   :  { %v821_v12 = vadd.f32 %v820_v53, %v679_v9  ;;  %v865_v53 = vld [vmem:[%s2734_s2 + $0x40] sm:$0xff]  ;;  %v2205_v2 = vpop.f32.mrf.mxu2 }
 0x153   :  { %v713_v21 = vadd.f32 %v712_v57, %v586_v11  ;;  %893 = vmatpush.msrb.mxu1 %v865_v53 }
 0x155   :  { %v528_v56 = vpop.f32.mrf.mxu3 }
 0x156   :  { %v529_v32 = vadd.f32 %v1879_v39, %v528_v56  ;;  %v249_v35 = vpop.f32.mrf.mxu0 }
 0x157   :  { %v250_v42 = vadd.f32 %v1879_v39, %v249_v35  ;;  %v2195_v43 = vpop.f32.mrf.mxu1 }
 0x158   :  { %2742 = vst [vmem:[#allocation8_spill] sm:$0xff] %v2195_v43  ;;  %v680_v16 = vmax.f32 %v529_v32, 0.0 }
 0x159   :  { %v587_v48 = vmax.f32 %v250_v42, 0.0 }
 0x15a   :  { %v2197_v49 = vadd.f32 %v821_v12, %v680_v16  ;;  %v2210_v32 = vpop.f32.mrf.mxu2 }
 0x15b   :  { %v714_v63 = vadd.f32 %v713_v21, %v587_v48 }
 0x15e   :  { %v252_v57 = vpop.f32.mrf.mxu0 }
 0x15f   :  { %v253_v27 = vadd.f32 %v1879_v39, %v252_v57  ;;  %v2203_v0 = vpop.f32.mrf.mxu1  ;;  %v2215_v57 = vpop.f32.mrf.mxu3 }
 0x160   :  { %2743 = vst [vmem:[#allocation9_spill] sm:$0xff] %v2203_v0 }
 0x161   :  { %v588_v6 = vmax.f32 %v253_v27, 0.0 }
 0x162   :  { %v2217_v27 = vpop.f32.mrf.mxu2 }
 0x163   :  { %v715_v9 = vadd.f32 %v714_v63, %v588_v6 }
 0x166   :  { %v255_v11 = vpop.f32.mrf.mxu0 }
 0x167   :  { %v256_v56 = vadd.f32 %v1879_v39, %v255_v11  ;;  %v2208_v12 = vpop.f32.mrf.mxu1  ;;  %v2222_v43 = vpop.f32.mrf.mxu3 }
 0x168   :  { %2744 = vst [vmem:[#allocation10_spill] sm:$0xff] %v2208_v12 }
 0x169   :  { %v589_v21 = vmax.f32 %v256_v56, 0.0 }
 0x16b   :  { %v716_v35 = vadd.f32 %v715_v9, %v589_v21  ;;  %v2224_v9 = vpop.f32.mrf.mxu2 }
 0x16e   :  { %v258_v42 = vpop.f32.mrf.mxu0 }
 0x16f   :  { %v259_v16 = vadd.f32 %v1879_v39, %v258_v42  ;;  %v2213_v48 = vpop.f32.mrf.mxu1  ;;  %v2231_v7 = vpop.f32.mrf.mxu3 }
 0x170   :  { %2745 = vst [vmem:[#allocation11_spill] sm:$0xff] %v2213_v48 }
 0x171   :  { %v590_v53 = vmax.f32 %v259_v16, 0.0 }
 0x173   :  { %v717_v0 = vadd.f32 %v716_v35, %v590_v53  ;;  %v376_v53 = vadd.f32 %v1879_v39, %v1899_v50 }
 0x176   :  { %v261_v63 = vpop.f32.mrf.mxu0 }
 0x177   :  { %v262_v6 = vadd.f32 %v1879_v39, %v261_v63  ;;  %v2220_v11 = vpop.f32.mrf.mxu1 }
 0x178   :  { %2746 = vst [vmem:[#allocation12_spill] sm:$0xff] %v2220_v11  ;;  %v379_v11 = vadd.f32 %v1879_v39, %v1918_v61 }
 0x179   :  { %v591_v56 = vmax.f32 %v262_v6, 0.0 }
 0x17b   :  { %v718_v12 = vadd.f32 %v717_v0, %v591_v56  ;;  %v2234_v56 = vpop.f32.mrf.mxu2 }
 0x17e   :  { %v264_v21 = vpop.f32.mrf.mxu0 }
 0x17f   :  { %v265_v42 = vadd.f32 %v1879_v39, %v264_v21  ;;  %v2227_v16 = vpop.f32.mrf.mxu1 }
 0x180   :  { %2747 = vst [vmem:[#allocation13_spill] sm:$0xff] %v2227_v16  ;;  %v629_v16 = vmax.f32 %v376_v53, 0.0  ;;  %v391_v53 = vadd.f32 %v1879_v39, %v1996_v59  ;;  %v400_v59 = vadd.f32 %v1879_v39, %v2065_v25 }
 0x181   :  { %v592_v48 = vmax.f32 %v265_v42, 0.0  ;;  %v630_v42 = vmax.f32 %v379_v11, 0.0 }
 0x183   :  { %v719_v35 = vadd.f32 %v718_v12, %v592_v48  ;;  %v382_v12 = vadd.f32 %v1879_v39, %v1937_v8  ;;  %v2248_v8 = vpop.f32.mrf.mxu3 }
 0x185   :  { %v631_v62 = vmax.f32 %v382_v12, 0.0  ;;  %v634_v12 = vmax.f32 %v391_v53, 0.0 }
 0x186   :  { %v267_v63 = vpop.f32.mrf.mxu0 }
 0x187   :  { %v268_v6 = vadd.f32 %v1879_v39, %v267_v63  ;;  %v372_v0 = vpop.f32.mrf.mxu1 }
 0x188   :  { %v373_v21 = vadd.f32 %v1879_v39, %v372_v0 }
 0x189   :  { %v593_v44 = vmax.f32 %v268_v6, 0.0  ;;  %v632_v6 = vmax.f32 %v385_v45, 0.0 }
 0x18a   :  { %v628_v48 = vmax.f32 %v373_v21, 0.0 }
 0x18b   :  { %v720_v50 = vadd.f32 %v719_v35, %v593_v44  ;;  %v2250_v35 = vpop.f32.mrf.mxu2  ;;  %v2266_v25 = vpop.f32.mrf.mxu3 }
 0x18c   :  { %v766_v63 = vadd.f32 %v629_v16, %v628_v48  ;;  %v394_v16 = vadd.f32 %v1879_v39, %v2021_v23  ;;  %v397_v48 = vadd.f32 %v1879_v39, %v2046_v60 }
 0x18e   :  { %v767_v34 = vadd.f32 %v766_v63, %v630_v42  ;;  %v270_v61 = vpop.f32.mrf.mxu0  ;;  %v635_v42 = vmax.f32 %v394_v16, 0.0 }
 0x18f   :  { %v271_v0 = vadd.f32 %v1879_v39, %v270_v61 }
 0x190   :  { %v768_v44 = vadd.f32 %v767_v34, %v631_v62  ;;  %v864_v34 = vld [vmem:[%s2734_s2 + $0x38] sm:$0xff]  ;;  %v636_v62 = vmax.f32 %v397_v48, 0.0 }
 0x191   :  { %v594_v11 = vmax.f32 %v271_v0, 0.0  ;;  %894 = vmatpush.msrb.mxu1 %v864_v34  ;;  %v637_v0 = vmax.f32 %v400_v59, 0.0  ;;  %v415_v59 = vadd.f32 %v1879_v39, %v2149_v10 }
 0x192   :  { %v769_v21 = vadd.f32 %v768_v44, %v632_v6  ;;  %v406_v6 = vadd.f32 %v1879_v39, %v2101_v4  ;;  %v863_v44 = vld [vmem:[%s2734_s2 + $0x30] sm:$0xff]  ;;  %v412_v4 = vadd.f32 %v1879_v39, %v2134_v54  ;;  %v421_v54 = vadd.f32 %v1879_v39, %v2167_v13 }
 0x193   :  { %v721_v41 = vadd.f32 %v720_v50, %v594_v11  ;;  %v403_v50 = vadd.f32 %v1879_v39, %v2086_v33  ;;  %895 = vmatpush.msrb.mxu1 %v863_v44  ;;  %v409_v33 = vadd.f32 %v1879_v39, %v2119_v3  ;;  %v418_v3 = vadd.f32 %v1879_v39, %v2158_v40 }
 0x194   :  { %v770_v45 = vadd.f32 %v769_v21, %v633_v24  ;;  %v2273_v24 = vpop.f32.mrf.mxu2  ;;  %v641_v34 = vmax.f32 %v412_v4, 0.0  ;;  %v427_v44 = vadd.f32 %v1879_v39, %v2182_v51  ;;  %v430_v13 = vadd.f32 %v1879_v39, %v2191_v31 }
 0x195   :  { %v638_v16 = vmax.f32 %v403_v50, 0.0  ;;  %v436_v51 = vadd.f32 %v1879_v39, %v2210_v32  ;;  %v286_v31 = vadd.f32 %v1879_v39, %v1816_v15  ;;  %v289_v32 = vadd.f32 %v1879_v39, %v1834_v22 }
 0x196   :  { %v771_v63 = vadd.f32 %v770_v45, %v634_v12  ;;  %v273_v38 = vpop.f32.mrf.mxu0  ;;  %v639_v12 = vmax.f32 %v406_v6, 0.0  ;;  %v646_v4 = vmax.f32 %v427_v44, 0.0  ;;  %v445_v15 = vadd.f32 %v1879_v39, %v2234_v56 }
 0x197   :  { %v274_v23 = vadd.f32 %v1879_v39, %v273_v38  ;;  %v292_v44 = vadd.f32 %v1879_v39, %v1852_v29  ;;  %v295_v22 = vadd.f32 %v1879_v39, %v1868_v36  ;;  %v451_v56 = vadd.f32 %v1879_v39, %v2273_v24  ;;  %v1416_v24 = vld [vmem:[%s2734_s2 + $0xf0] sm:$0xff] }
 0x198   :  { %v772_v61 = vadd.f32 %v771_v63, %v635_v42  ;;  %v862_v42 = vld [vmem:[%s2734_s2 + $0x28] sm:$0xff]  ;;  %v298_v29 = vadd.f32 %v1879_v39, %v1891_v47  ;;  %v1417_v47 = vld [vmem:[%s2734_s2 + $0xf8] sm:$0xff] }
 0x199   :  { %v595_v60 = vmax.f32 %v274_v23, 0.0  ;;  %896 = vmatpush.msrb.mxu1 %v862_v42  ;;  %v642_v23 = vmax.f32 %v415_v59, 0.0  ;;  %989 = vmatpush.msrb.mxu2 %v1417_v47 }
 0x19a   :  { %v773_v53 = vadd.f32 %v772_v61, %v636_v62  ;;  %v2288_v62 = vpop.f32.mrf.mxu3 }
 0x19b   :  { %v2271_v11 = vadd.f32 %v721_v41, %v595_v60  ;;  %v640_v41 = vmax.f32 %v409_v33, 0.0  ;;  %v643_v60 = vmax.f32 %v418_v3, 0.0  ;;  %990 = vmatpush.msrb.mxu2 %v1416_v24 }
 0x19c   :  { %v774_v21 = vadd.f32 %v773_v53, %v637_v0  ;;  %v453_v61 = vpop.f32.mrf.mxu2  ;;  %v424_v0 = vadd.f32 %v1879_v39, %v2176_v28  ;;  %v644_v53 = vmax.f32 %v421_v54, 0.0  ;;  %v433_v28 = vadd.f32 %v1879_v39, %v2205_v2 }
 0x19d   :  { %v439_v2 = vadd.f32 %v1879_v39, %v2217_v27 }
 0x19e   :  { %v775_v48 = vadd.f32 %v774_v21, %v638_v16  ;;  %v276_v45 = vpop.f32.mrf.mxu0  ;;  %v645_v33 = vmax.f32 %v424_v0, 0.0 }
 0x19f   :  { %v650_v27 = vmax.f32 %v439_v2, 0.0  ;;  %v654_v2 = vmax.f32 %v451_v56, 0.0 }
 0x1a0   :  { %v776_v63 = vadd.f32 %v775_v48, %v639_v12  ;;  %v277_v12 = vadd.f32 %v1879_v39, %v276_v45 }
 0x1a2   :  { %v777_v38 = vadd.f32 %v776_v63, %v640_v41  ;;  %v647_v41 = vmax.f32 %v430_v13, 0.0  ;;  %v2302_v63 = vpop.f32.mrf.mxu3  ;;  %v596_v3 = vmax.f32 %v277_v12, 0.0  ;;  %v600_v13 = vmax.f32 %v289_v32, 0.0 }
 0x1a3   :  { %v603_v32 = vmax.f32 %v298_v29, 0.0 }
 0x1a4   :  { %v778_v50 = vadd.f32 %v777_v38, %v641_v34  ;;  %v456_v38 = vpop.f32.mrf.mxu2 }
 0x1a6   :  { %v779_v6 = vadd.f32 %v778_v50, %v642_v23  ;;  %v279_v10 = vpop.f32.mrf.mxu0  ;;  %v648_v23 = vmax.f32 %v433_v28, 0.0  ;;  %v442_v50 = vadd.f32 %v1879_v39, %v2224_v9  ;;  %v448_v9 = vadd.f32 %v1879_v39, %v2250_v35  ;;  %v860_v35 = vld [vmem:[%s2734_s2 + $0x18] sm:$0xff] }
 0x1a7   :  { %v280_v16 = vadd.f32 %v1879_v39, %v279_v10  ;;  %v601_v28 = vmax.f32 %v292_v44, 0.0 }
 0x1a8   :  { %v780_v40 = vadd.f32 %v779_v6, %v643_v60  ;;  %v649_v6 = vmax.f32 %v436_v51, 0.0  ;;  %v653_v51 = vmax.f32 %v448_v9, 0.0 }
 0x1a9   :  { %v597_v42 = vmax.f32 %v280_v16, 0.0 }
 0x1aa   :  { %v781_v21 = vadd.f32 %v780_v40, %v644_v53  ;;  %v599_v53 = vmax.f32 %v286_v31, 0.0  ;;  %v301_v31 = vadd.f32 %v1879_v39, %v1910_v58  ;;  %v2352_v58 = vld [vmem:[%s2733_s3] ss:$0 sm:$0xff] }
 0x1ab   :  { %v729_v60 = vadd.f32 %v597_v42, %v596_v3  ;;  %v861_v42 = vld [vmem:[%s2734_s2 + $0x20] sm:$0xff]  ;;  %v466_v56 = vadd.f32 %v2352_v58, %v1845_v26 }
 0x1ac   :  { %v782_v48 = vadd.f32 %v781_v21, %v645_v33  ;;  %v651_v33 = vmax.f32 %v442_v50, 0.0  ;;  %897 = vmatpush.msrb.mxu1 %v861_v42  ;;  %v1415_v50 = vld [vmem:[%s2734_s2 + $0xe8] sm:$0xff] }
 0x1ad   :  { %991 = vmatpush.msrb.mxu2 %v1415_v50  ;;  %v659_v47 = vmax.f32 %v466_v56, 0.0 }
 0x1ae   :  { %v783_v59 = vadd.f32 %v782_v48, %v646_v4  ;;  %v282_v34 = vpop.f32.mrf.mxu0  ;;  %v652_v4 = vmax.f32 %v445_v15, 0.0  ;;  %898 = vmatpush.msrb.mxu1 %v860_v35  ;;  %v604_v15 = vmax.f32 %v301_v31, 0.0 }
 0x1af   :  { %v283_v45 = vadd.f32 %v1879_v39, %v282_v34  ;;  %v602_v34 = vmax.f32 %v295_v22, 0.0 }
 0x1b0   :  { %v784_v54 = vadd.f32 %v783_v59, %v647_v41  ;;  %v2331_v41 = vpop.f32.mrf.mxu3  ;;  %v454_v59 = vadd.f32 %v1879_v39, %v453_v61 }
 0x1b1   :  { %v598_v0 = vmax.f32 %v283_v45, 0.0  ;;  %v459_v45 = vpop.f32.mrf.mxu2 }
 0x1b2   :  { %v785_v10 = vadd.f32 %v784_v54, %v648_v23  ;;  %v859_v23 = vld [vmem:[%s2734_s2 + $0x10] sm:$0xff]  ;;  %v457_v54 = vadd.f32 %v1879_v39, %v456_v38  ;;  %v655_v38 = vmax.f32 %v454_v59, 0.0 }
 0x1b3   :  { %v730_v40 = vadd.f32 %v729_v60, %v598_v0  ;;  %v304_v60 = vadd.f32 %v2352_v58, %v1929_v5  ;;  %899 = vmatpush.msrb.mxu1 %v859_v23  ;;  %v857_v5 = vld [vmem:[%s2734_s2] sm:$0xff] }
 0x1b4   :  { %v786_v16 = vadd.f32 %v785_v10, %v649_v6  ;;  %v858_v6 = vld [vmem:[%s2734_s2 + $0x8] sm:$0xff]  ;;  %v460_v10 = vadd.f32 %v2352_v58, %v459_v45 }
 0x1b5   :  { %v731_v21 = vadd.f32 %v730_v40, %v599_v53  ;;  %v307_v53 = vadd.f32 %v2352_v58, %v1948_v18  ;;  %900 = vmatpush.msrb.mxu1 %v858_v6 }
 0x1b6   :  { %v787_v12 = vadd.f32 %v786_v16, %v650_v27  ;;  %v656_v27 = vmax.f32 %v457_v54, 0.0  ;;  %v605_v16 = vmax.f32 %v304_v60, 0.0 }
 0x1b7   :  { %v732_v48 = vadd.f32 %v731_v21, %v600_v13  ;;  %v463_v13 = vadd.f32 %v2352_v58, %v1827_v19  ;;  %v657_v21 = vmax.f32 %v460_v10, 0.0  ;;  %901 = vmatpush.msrb.mxu1 %v857_v5  ;;  %v606_v18 = vmax.f32 %v307_v53, 0.0 }
 0x1b8   :  { %v788_v36 = vadd.f32 %v787_v12, %v651_v33  ;;  %v310_v33 = vadd.f32 %v2352_v58, %v1965_v37  ;;  %v313_v12 = vadd.f32 %v2352_v58, %v1988_v55  ;;  %v316_v37 = vadd.f32 %v2352_v58, %v2013_v17 }
 0x1b9   :  { %v733_v3 = vadd.f32 %v732_v48, %v601_v28  ;;  %v555_v28 = vpop.f32.mrf.mxu3  ;;  %v658_v35 = vmax.f32 %v463_v13, 0.0  ;;  %v532_v55 = vadd.f32 %v2352_v58, %v2215_v57  ;;  %v535_v17 = vadd.f32 %v2352_v58, %v2222_v43 }
 0x1ba   :  { %v789_v61 = vadd.f32 %v788_v36, %v652_v4  ;;  %v607_v48 = vmax.f32 %v310_v33, 0.0  ;;  %v608_v36 = vmax.f32 %v313_v12, 0.0  ;;  %v609_v26 = vmax.f32 %v316_v37, 0.0  ;;  %v2749_v33 = vld [vmem:[#allocation3_spill] sm:$0xff]  ;;  %v2751_v37 = vld [vmem:[#allocation5_spill] sm:$0xff] }
 0x1bb   :  { %v734_v0 = vadd.f32 %v733_v3, %v602_v34  ;;  %v322_v34 = vadd.f32 %v2352_v58, %v2057_v14  ;;  %v325_v3 = vadd.f32 %v2352_v58, %v2078_v46  ;;  %v681_v23 = vmax.f32 %v532_v55, 0.0 }
 0x1bc   :  { %v790_v39 = vadd.f32 %v789_v61, %v653_v51  ;;  %v319_v51 = vadd.f32 %v2352_v58, %v2038_v20  ;;  %v538_v57 = vadd.f32 %v2352_v58, %v2231_v7  ;;  %v682_v14 = vmax.f32 %v535_v17, 0.0  ;;  %v2753_v17 = vld [vmem:[#allocation7_spill] sm:$0xff] }
 0x1bd   :  { %v735_v44 = vadd.f32 %v734_v0, %v603_v32  ;;  %v611_v54 = vmax.f32 %v322_v34, 0.0  ;;  %v541_v43 = vadd.f32 %v2352_v58, %v2248_v8  ;;  %v612_v32 = vmax.f32 %v325_v3, 0.0 }
 0x1be   :  { %v791_v40 = vadd.f32 %v790_v39, %v654_v2  ;;  %v610_v20 = vmax.f32 %v319_v51, 0.0  ;;  %v328_v2 = vadd.f32 %v2352_v58, %v2096_v1  ;;  %v331_v46 = vadd.f32 %v2352_v58, %v2114_v30  ;;  %v2748_v30 = vld [vmem:[#allocation2_spill] sm:$0xff] }
 0x1bf   :  { %v736_v9 = vadd.f32 %v735_v44, %v604_v15  ;;  %v823_v0 = vadd.f32 %v2197_v49, %v681_v23  ;;  %v683_v6 = vmax.f32 %v538_v57, 0.0  ;;  %v544_v7 = vadd.f32 %v2352_v58, %v2266_v25 }
 0x1c0   :  { %v792_v22 = vadd.f32 %v791_v40, %v655_v38  ;;  %v613_v38 = vmax.f32 %v328_v2, 0.0  ;;  %v334_v1 = vadd.f32 %v2352_v58, %v2129_v52  ;;  %v684_v15 = vmax.f32 %v541_v43, 0.0  ;;  %v2754_v2 = vld [vmem:[#allocation8_spill] sm:$0xff] }
 0x1c1   :  { %v737_v4 = vadd.f32 %v736_v9, %v605_v16  ;;  %v558_v60 = vpop.f32.mrf.mxu3  ;;  %v824_v10 = vadd.f32 %v823_v0, %v682_v14  ;;  %v547_v8 = vadd.f32 %v2352_v58, %v2288_v62  ;;  %v614_v44 = vmax.f32 %v331_v46, 0.0  ;;  %v2755_v46 = vld [vmem:[#allocation9_spill] sm:$0xff] }
 0x1c2   :  { %v793_v29 = vadd.f32 %v792_v22, %v656_v27  ;;  %v337_v5 = vadd.f32 %v2352_v58, %v2748_v30  ;;  %v685_v40 = vmax.f32 %v544_v7, 0.0  ;;  %v550_v25 = vadd.f32 %v2352_v58, %v2302_v63 }
 0x1c3   :  { %v738_v42 = vadd.f32 %v737_v4, %v606_v18  ;;  %v825_v49 = vadd.f32 %v824_v10, %v683_v6  ;;  %v615_v16 = vmax.f32 %v334_v1, 0.0  ;;  %v340_v52 = vadd.f32 %v2352_v58, %v2749_v33  ;;  %v2750_v18 = vld [vmem:[#allocation4_spill] sm:$0xff]  ;;  %v2756_v10 = vld [vmem:[#allocation10_spill] sm:$0xff] }
 0x1c4   :  { %v794_v19 = vadd.f32 %v793_v29, %v657_v21  ;;  %v686_v13 = vmax.f32 %v547_v8, 0.0  ;;  %v553_v62 = vadd.f32 %v2352_v58, %v2331_v41  ;;  %v616_v21 = vmax.f32 %v337_v5, 0.0  ;;  %v2757_v5 = vld [vmem:[#allocation11_spill] sm:$0xff] }
 0x1c5   :  { %v739_v59 = vadd.f32 %v738_v42, %v607_v48  ;;  %v826_v9 = vadd.f32 %v825_v49, %v684_v15  ;;  %v343_v12 = vadd.f32 %v2352_v58, %v2750_v18  ;;  %v687_v56 = vmax.f32 %v550_v25, 0.0 }
 0x1c6   :  { %v795_v24 = vadd.f32 %v794_v19, %v658_v35  ;;  %v556_v29 = vadd.f32 %v2352_v58, %v555_v28  ;;  %v617_v48 = vmax.f32 %v340_v52, 0.0  ;;  %v346_v42 = vadd.f32 %v2352_v58, %v2751_v37  ;;  %v1409_v37 = vld [vmem:[%s2734_s2 + $0xb8] sm:$0xff] }
 0x1c7   :  { %v740_v31 = vadd.f32 %v739_v59, %v608_v36  ;;  %v827_v4 = vadd.f32 %v826_v9, %v685_v40  ;;  %v688_v36 = vmax.f32 %v553_v62, 0.0  ;;  %v559_v51 = vadd.f32 %v2352_v58, %v558_v60  ;;  %v2752_v59 = vld [vmem:[#allocation6_spill] sm:$0xff]  ;;  %v2758_v9 = vld [vmem:[#allocation12_spill] sm:$0xff] }
 0x1c8   :  { %v2385_v45 = vadd.f32 %v795_v24, %v659_v47  ;;  %v618_v55 = vmax.f32 %v343_v12, 0.0  ;;  %v349_v47 = vadd.f32 %v2352_v58, %v2752_v59  ;;  %v619_v3 = vmax.f32 %v346_v42, 0.0  ;;  %v2759_v12 = vld [vmem:[#allocation13_spill] sm:$0xff] }
 0x1c9   :  { %v741_v61 = vadd.f32 %v740_v31, %v609_v26  ;;  %v561_v35 = vpop.f32.mrf.mxu3  ;;  %v828_v19 = vadd.f32 %v827_v4, %v686_v13  ;;  %v689_v26 = vmax.f32 %v556_v29, 0.0  ;;  %v352_v31 = vadd.f32 %v2352_v58, %v2753_v17 }
 0x1ca   :  { %v562_v34 = vadd.f32 %v2352_v58, %v561_v35  ;;  %v690_v23 = vmax.f32 %v559_v51, 0.0  ;;  %v358_v60 = vadd.f32 %v2352_v58, %v2755_v46  ;;  %v1551_v0 = vmov 256.0  }
 0x1cb   :  { %v742_v50 = vadd.f32 %v741_v61, %v610_v20  ;;  %v829_v24 = vadd.f32 %v828_v19, %v687_v56  ;;  %v620_v61 = vmax.f32 %v349_v47, 0.0  ;;  %1534 = vrcp.f32 %v1551_v0 }
 0x1cc   :  { %v691_v43 = vmax.f32 %v562_v34, 0.0  ;;  %v361_v15 = vadd.f32 %v2352_v58, %v2756_v10  ;;  %v623_v30 = vmax.f32 %v358_v60, 0.0  ;;  %v364_v49 = vadd.f32 %v2352_v58, %v2757_v5 }
 0x1cd   :  { %v743_v39 = vadd.f32 %v742_v50, %v611_v54  ;;  %v830_v20 = vadd.f32 %v829_v24, %v688_v36  ;;  %v355_v54 = vadd.f32 %v2352_v58, %v2754_v2  ;;  %v723_v40 = vrot.slane %v2271_v11, 4  ;;  %v1408_v36 = vld [vmem:[%s2734_s2 + $0xb0] sm:$0xff] }
 0x1ce   :  { %v624_v52 = vmax.f32 %v361_v15, 0.0  ;;  %v367_v13 = vadd.f32 %v2352_v58, %v2758_v9  ;;  %v625_v18 = vmax.f32 %v364_v49, 0.0  ;;  %v370_v4 = vadd.f32 %v2352_v58, %v2759_v12 }
 0x1cf   :  { %v744_v53 = vadd.f32 %v743_v39, %v612_v32  ;;  %v831_v14 = vadd.f32 %v830_v20, %v689_v26  ;;  %v621_v32 = vmax.f32 %v352_v31, 0.0  ;;  %v1414_v39 = vld [vmem:[%s2734_s2 + $0xe0] sm:$0xff]  ;;  %v622_v1 = vmax.f32 %v355_v54, 0.0 }
 0x1d0   :  { %992 = vmatpush.msrb.mxu2 %v1414_v39  ;;  %v724_v56 = vadd.f32 %v723_v40, %v2271_v11  ;;  %v626_v42 = vmax.f32 %v367_v13, 0.0  ;;  %v627_v58 = vmax.f32 %v370_v4, 0.0  ;;  %v851_v10 = vlaneseq }
 0x1d1   :  { %v745_v27 = vadd.f32 %v744_v53, %v613_v38  ;;  %v832_v6 = vadd.f32 %v831_v14, %v690_v23  ;;  %v1413_v38 = vld [vmem:[%s2734_s2 + $0xd8] sm:$0xff]  ;;  %v1535_v33 = vpop.eup %1534 }
 0x1d2   :  { %993 = vmatpush.msrb.mxu2 %v1413_v38  ;;  %v725_v51 = vrot.slane %v724_v56, 2  ;;  %vm845_vm0 = vweird.f32 %v1535_v33  ;;  %v852_v15 = vshrl.u32 %v851_v10, 7 }
 0x1d3   :  { %v746_v22 = vadd.f32 %v745_v27, %v614_v44  ;;  %v833_v8 = vadd.f32 %v832_v6, %v691_v43  ;;  %v1412_v44 = vld [vmem:[%s2734_s2 + $0xd0] sm:$0xff]  ;;  %v797_v27 = vrot.slane %v2385_v45, 4 }
 0x1d4   :  { %994 = vmatpush.msrb.mxu2 %v1412_v44  ;;  %v726_v24 = vadd.f32 %v725_v51, %v724_v56  ;;  %vm853_vm4 = vcmp.lt.s32.totalorder %v852_v15, 2  ;;  %v1521_v44 = vld [vmem:[%s2733_s3 + $0x1] ss:$0 sm:$0xff] }
 0x1d5   :  { %v747_v63 = vadd.f32 %v746_v22, %v615_v16  ;;  %v1411_v16 = vld [vmem:[%s2734_s2 + $0xc8] sm:$0xff]  ;;  %v834_v62 = vrot.slane %v833_v8, 4  ;;  %v1426_v15 = vld [vmem:[%s2734_s2 + $0x140] sm:$0xff] }
 0x1d6   :  { %995 = vmatpush.msrb.mxu2 %v1411_v16 }
 0x1d7   :  { %v748_v41 = vadd.f32 %v747_v63, %v616_v21  ;;  %v1410_v21 = vld [vmem:[%s2734_s2 + $0xc0] sm:$0xff]  ;;  %v841_v63 = vmul.f32 256.0, %v1535_v33  ;;  %v835_v35 = vadd.f32 %v834_v62, %v833_v8  ;;  %v1552_v8 = vmov 0.0  }
 0x1d8   :  { %996 = vmatpush.msrb.mxu2 %v1410_v21 }
 0x1d9   :  { %v749_v28 = vadd.f32 %v748_v41, %v617_v48  ;;  %v798_v48 = vadd.f32 %v797_v27, %v2385_v45  ;;  %v842_v41 = vsub.f32 1.0, %v841_v63  ;;  %v1407_v45 = vld [vmem:[%s2734_s2 + $0xa8] sm:$0xff]  ;;  %v836_v59 = vrot.slane %v835_v35, 2 }
 0x1da   :  { %997 = vmatpush.msrb.mxu2 %v1409_v37 }
 0x1db   :  { %v750_v57 = vadd.f32 %v749_v28, %v618_v55  ;;  %v799_v55 = vrot.slane %v798_v48, 2  ;;  %v843_v34 = vmul.f32 %v1535_v33, %v842_v41  ;;  %v837_v17 = vadd.f32 %v836_v59, %v835_v35 }
 0x1dc   :  { %998 = vmatpush.msrb.mxu2 %v1408_v36 }
 0x1dd   :  { %v751_v50 = vadd.f32 %v750_v57, %v619_v3  ;;  %v800_v28 = vadd.f32 %v799_v55, %v798_v48  ;;  %v727_v3 = vrot.slane %v726_v24, 1  ;;  %v844_v23 = vadd.f32 %v1535_v33, %v843_v34 }
 0x1de   :  { %999 = vmatpush.msrb.mxu2 %v1407_v45 }
 0x1df   :  { %v752_v7 = vadd.f32 %v751_v50, %v620_v61  ;;  %v801_v57 = vrot.slane %v800_v28, 1  ;;  %v838_v61 = vrot.slane %v837_v17, 1  ;;  %v728_v54 = vadd.f32 %v727_v3, %v726_v24  ;;  %v1406_v24 = vld [vmem:[%s2734_s2 + $0xa0] sm:$0xff]  ;;  %v1433_v3 = vld [vmem:[%s2734_s2 + $0x178] sm:$0xff] }
 0x1e0   :  { %v846_v43 = vsel %vm845_vm0, %v1535_v33, %v844_v23  ;;  %1000 = vmatpush.msrb.mxu2 %v1406_v24  ;;  %v1404_v23 = vld [vmem:[%s2734_s2 + $0x90] sm:$0xff]  ;;  %1091 = vmatpush.msrb.mxu3 %v1433_v3 }
 0x1e1   :  { %v753_v53 = vadd.f32 %v752_v7, %v621_v32  ;;  %v802_v50 = vadd.f32 %v801_v57, %v800_v28  ;;  %v839_v32 = vadd.f32 %v838_v61, %v837_v17  ;;  %v847_v60 = vmul.f32 %v846_v43, %v728_v54  ;;  %v1405_v28 = vld [vmem:[%s2734_s2 + $0x98] sm:$0xff]  ;;  %v1403_v57 = vld [vmem:[%s2734_s2 + $0x88] sm:$0xff] }
 0x1e2   :  { %1001 = vmatpush.msrb.mxu2 %v1405_v28  ;;  %v1431_v54 = vld [vmem:[%s2734_s2 + $0x168] sm:$0xff] }
 0x1e3   :  { %v754_v25 = vadd.f32 %v753_v53, %v622_v1  ;;  %v849_v6 = vmul.f32 %v846_v43, %v802_v50  ;;  %v850_v7 = vmul.f32 %v846_v43, %v839_v32  ;;  %v2461_v53 = vsel %vm853_vm4, 1.0, %v1552_v8  ;;  %v1430_v32 = vld [vmem:[%s2734_s2 + $0x160] sm:$0xff]  ;;  %v1425_v8 = vld [vmem:[%s2734_s2 + $0x138] sm:$0xff] }
 0x1e4   :  { %1002 = vmatpush.msrb.mxu2 %v1404_v23 }
 0x1e5   :  { %v755_v22 = vadd.f32 %v754_v25, %v623_v30  ;;  %v2467_v30 = vsub.f32 1.0, %v2461_v53 }
 0x1e6   :  { %1003 = vmatpush.msrb.mxu2 %v1403_v57 }
 0x1e7   :  { %v756_v29 = vadd.f32 %v755_v22, %v624_v52 }
 0x1e9   :  { %v757_v19 = vadd.f32 %v756_v29, %v625_v18 }
 0x1eb   :  { %v758_v11 = vadd.f32 %v757_v19, %v626_v42 }
 0x1ed   :  { %v759_v47 = vadd.f32 %v758_v11, %v627_v58 }
 0x1ef   :  { %v760_v26 = vrot.slane %v759_v47, 4 }
 0x1f1   :  { %v761_v31 = vadd.f32 %v760_v26, %v759_v47 }
 0x1f3   :  { %v762_v20 = vrot.slane %v761_v31, 2 }
 0x1f5   :  { %v763_v2 = vadd.f32 %v762_v20, %v761_v31  ;;  %v1432_v20 = vld [vmem:[%s2734_s2 + $0x170] sm:$0xff] }
 0x1f6   :  { %1092 = vmatpush.msrb.mxu3 %v1432_v20 }
 0x1f7   :  { %v764_v14 = vrot.slane %v763_v2, 1 }
 0x1f8   :  { %1093 = vmatpush.msrb.mxu3 %v1431_v54 }
 0x1f9   :  { %v765_v46 = vadd.f32 %v764_v14, %v763_v2  ;;  %v1402_v14 = vld [vmem:[%s2734_s2 + $0x80] sm:$0xff] }
 0x1fa   :  { %1004 = vmatpush.msrb.mxu2 %v1402_v14  ;;  %1094 = vmatpush.msrb.mxu3 %v1430_v32 }
 0x1fb   :  { %v848_v0 = vmul.f32 %v846_v43, %v765_v46 }
 0x1fd   :  { %v880_v39 = vsel %vm879_vm1, %v848_v0, %v847_v60  ;;  %v1429_v0 = vld [vmem:[%s2734_s2 + $0x158] sm:$0xff] }
 0x1fe   :  { %v882_v38 = vsel %vm881_vm2, %v849_v6, %v880_v39  ;;  %v1428_v39 = vld [vmem:[%s2734_s2 + $0x150] sm:$0xff]  ;;  %1095 = vmatpush.msrb.mxu3 %v1429_v0 }
 0x1ff   :  { %v884_v1 = vsel %vm883_vm3, %v850_v7, %v882_v38 }
 0x200   :  { %902 = vmatmul.f32.vlgmr.msrb.gmra.mxu1 %v884_v1  ;;  %v1427_v1 = vld [vmem:[%s2734_s2 + $0x148] sm:$0xff]  ;;  %1096 = vmatpush.msrb.mxu3 %v1428_v39 }
 0x201   :  { %v1419_v39 = vld [vmem:[%s2734_s2 + $0x108] sm:$0xff] }
 0x202   :  { %1097 = vmatpush.msrb.mxu3 %v1427_v1 }
 0x204   :  { %1098 = vmatpush.msrb.mxu3 %v1426_v15 }
 0x206   :  { %1099 = vmatpush.msrb.mxu3 %v1425_v8 }
 0x27d   :  { %v903_v5 = vpop.f32.mrf.mxu1 }
 0x27e   :  { %v904_v49 = vadd.f32 %v1521_v44, %v903_v5  ;;  %v1424_v44 = vld [vmem:[%s2734_s2 + $0x130] sm:$0xff]  ;;  %v1423_v5 = vld [vmem:[%s2734_s2 + $0x128] sm:$0xff] }
 0x27f   :  { %1100 = vmatpush.msrb.mxu3 %v1424_v44 }
 0x280   :  { %v906_v40 = vmul.f32 %v2461_v53, %v904_v49  ;;  %v917_v25 = vmul.f32 %v904_v49, %v2467_v30 }
 0x281   :  { %1101 = vmatpush.msrb.mxu3 %v1423_v5 }
 0x282   :  { %v908_v27 = vsel %vm907_vm5, %v906_v40, 0.0  ;;  %v918_v16 = vsel %vm907_vm5, %v917_v25, 0.0  ;;  %v1422_v40 = vld [vmem:[%s2734_s2 + $0x120] sm:$0xff] }
 0x283   :  { %v909_v33 = vrot.slane %v908_v27, 4  ;;  %v919_v52 = vrot.slane %v918_v16, 4  ;;  %1102 = vmatpush.msrb.mxu3 %v1422_v40 }
 0x285   :  { %v910_v9 = vadd.f32 %v909_v33, %v908_v27  ;;  %v920_v13 = vadd.f32 %v919_v52, %v918_v16  ;;  %v1522_v33 = vld [vmem:[%s2733_s3 + $0x2] ss:$0 sm:$0xff] }
 0x287   :  { %v911_v62 = vrot.slane %v910_v9, 2  ;;  %v921_v22 = vrot.slane %v920_v13, 2 }
 0x289   :  { %v912_v21 = vadd.f32 %v911_v62, %v910_v9  ;;  %v922_v18 = vadd.f32 %v921_v22, %v920_v13  ;;  %v1523_v62 = vld [vmem:[%s2733_s3 + $0x3] ss:$0 sm:$0xff] }
 0x28b   :  { %v913_v12 = vrot.slane %v912_v21, 1  ;;  %v923_v4 = vrot.slane %v922_v18, 1 }
 0x28d   :  { %v914_v56 = vadd.f32 %v913_v12, %v912_v21  ;;  %v924_v29 = vadd.f32 %v923_v4, %v922_v18  ;;  %v1524_v4 = vld [vmem:[%s2733_s3 + $0x4] ss:$0 sm:$0xff] }
 0x28f   :  { %v915_v63 = vmul.f32 0.5, %v914_v56  ;;  %v925_v48 = vmul.f32 0.5, %v924_v29 }
 0x291   :  { %v916_v37 = vmul.f32 %v2461_v53, %v915_v63  ;;  %v926_v42 = vmul.f32 %v925_v48, %v2467_v30 }
 0x293   :  { %v927_v35 = vadd.f32 %v926_v42, %v916_v37 }
 0x295   :  { %v2475_v19 = vsub.f32 %v904_v49, %v927_v35 }
 0x297   :  { %v929_v36 = vmul.f32 %v2475_v19, %v2475_v19  ;;  %v953_v13 = vmul.f32 %v1522_v33, %v2475_v19 }
 0x299   :  { %v930_v58 = vmul.f32 %v2461_v53, %v929_v36  ;;  %v940_v51 = vmul.f32 %v929_v36, %v2467_v30 }
 0x29b   :  { %v931_v11 = vsel %vm907_vm5, %v930_v58, 0.0  ;;  %v941_v41 = vsel %vm907_vm5, %v940_v51, 0.0 }
 0x29c   :  { %v932_v55 = vrot.slane %v931_v11, 4  ;;  %v942_v45 = vrot.slane %v941_v41, 4 }
 0x29e   :  { %v933_v59 = vadd.f32 %v932_v55, %v931_v11  ;;  %v943_v47 = vadd.f32 %v942_v45, %v941_v41 }
 0x2a0   :  { %v934_v26 = vrot.slane %v933_v59, 2  ;;  %v944_v34 = vrot.slane %v943_v47, 2 }
 0x2a2   :  { %v935_v17 = vadd.f32 %v934_v26, %v933_v59  ;;  %v945_v31 = vadd.f32 %v944_v34, %v943_v47 }
 0x2a4   :  { %v936_v61 = vrot.slane %v935_v17, 1  ;;  %v946_v2 = vrot.slane %v945_v31, 1 }
 0x2a6   :  { %v937_v43 = vadd.f32 %v936_v61, %v935_v17  ;;  %v947_v50 = vadd.f32 %v946_v2, %v945_v31 }
 0x2a8   :  { %v938_v46 = vmul.f32 0.5, %v937_v43  ;;  %v948_v60 = vmul.f32 0.5, %v947_v50 }
 0x2aa   :  { %v939_v6 = vmul.f32 %v2461_v53, %v938_v46  ;;  %v949_v7 = vmul.f32 %v948_v60, %v2467_v30  ;;  %v1421_v60 = vld [vmem:[%s2734_s2 + $0x118] sm:$0xff] }
 0x2ab   :  { %1103 = vmatpush.msrb.mxu3 %v1421_v60 }
 0x2ac   :  { %v950_v38 = vadd.f32 %v949_v7, %v939_v6  ;;  %v1420_v7 = vld [vmem:[%s2734_s2 + $0x110] sm:$0xff] }
 0x2ad   :  { %1104 = vmatpush.msrb.mxu3 %v1420_v7 }
 0x2ae   :  { %v954_v10 = vadd.f32 1e-05, %v950_v38 }
 0x2af   :  { %1105 = vmatpush.msrb.mxu3 %v1419_v39  ;;  %v1440_v39 = vld [vmem:[%s2734_s2 + $0x1b0] sm:$0xff] }
 0x2b0   :  { %1536 = vrsqrt.f32 %v954_v10  ;;  %vm961_vm7 = vweird.f32 %v954_v10 }
 0x2b6   :  { %v1537_v49 = vpop.eup %1536 }
 0x2b7   :  { %v956_v25 = vmul.f32 %v1537_v49, %v954_v10  ;;  %vm962_vm6 = vweird.f32 %v1537_v49  ;;  %v1418_v10 = vld [vmem:[%s2734_s2 + $0x100] sm:$0xff] }
 0x2b8   :  { %vm963_vm8 = vmor %vm961_vm7, %vm962_vm6  ;;  %1106 = vmatpush.msrb.mxu3 %v1418_v10  ;;  %v1439_v10 = vld [vmem:[%s2734_s2 + $0x1a8] sm:$0xff] }
 0x2b9   :  { %v957_v27 = vmul.f32 %v1537_v49, %v956_v25 }
 0x2bb   :  { %v958_v16 = vmul.f32 0.5, %v957_v27 }
 0x2bd   :  { %v959_v52 = vsub.f32 1.5, %v958_v16 }
 0x2bf   :  { %v960_v9 = vmul.f32 %v1537_v49, %v959_v52 }
 0x2c1   :  { %v964_v22 = vsel %vm963_vm8, %v1537_v49, %v960_v9  ;;  %vm1373_vm8 = vcmask 1043458  }
 0x2c2   :  { %v965_v21 = vmul.f32 %v964_v22, %v953_v13  ;;  %v1525_v13 = vld [vmem:[%s2733_s3 + $0x5] ss:$0 sm:$0xff] }
 0x2c4   :  { %v968_v18 = vadd.f32 %v1523_v62, %v965_v21 }
 0x2c6   :  { %v969_v12 = vmax.f32 %v968_v18, 0.0  ;;  %v1526_v18 = vld [vmem:[%s2733_s3 + $0x6] ss:$0 sm:$0xff] }
 0x2c8   :  { %1005 = vmatmul.f32.vlgmr.msrb.gmra.mxu2 %v969_v12 }
 0x34b   :  { %v1006_v56 = vpop.f32.mrf.mxu2 }
 0x34c   :  { %v1007_v29 = vadd.f32 %v1524_v4, %v1006_v56 }
 0x34e   :  { %v1009_v63 = vmul.f32 %v2461_v53, %v1007_v29  ;;  %v1019_v48 = vmul.f32 %v1007_v29, %v2467_v30 }
 0x350   :  { %v1010_v37 = vsel %vm907_vm5, %v1009_v63, 0.0  ;;  %v1020_v42 = vsel %vm907_vm5, %v1019_v48, 0.0  ;;  %v1527_v63 = vld [vmem:[%s2733_s3 + $0x7] ss:$0 sm:$0xff] }
 0x351   :  { %v1011_v35 = vrot.slane %v1010_v37, 4  ;;  %v1021_v19 = vrot.slane %v1020_v42, 4 }
 0x353   :  { %v1012_v36 = vadd.f32 %v1011_v35, %v1010_v37  ;;  %v1022_v58 = vadd.f32 %v1021_v19, %v1020_v42 }
 0x355   :  { %v1013_v51 = vrot.slane %v1012_v36, 2  ;;  %v1023_v11 = vrot.slane %v1022_v58, 2 }
 0x357   :  { %v1014_v41 = vadd.f32 %v1013_v51, %v1012_v36  ;;  %v1024_v55 = vadd.f32 %v1023_v11, %v1022_v58 }
 0x359   :  { %v1015_v45 = vrot.slane %v1014_v41, 1  ;;  %v1025_v59 = vrot.slane %v1024_v55, 1 }
 0x35b   :  { %v1016_v47 = vadd.f32 %v1015_v45, %v1014_v41  ;;  %v1026_v24 = vadd.f32 %v1025_v59, %v1024_v55  ;;  %v1449_v59 = vld [vmem:[%s2734_s2 + $0x1f8] sm:$0xff] }
 0x35c   :  { %1192 = vmatpush.msra.mxu1 %v1449_v59 }
 0x35d   :  { %v1017_v26 = vmul.f32 0.5, %v1016_v47  ;;  %v1027_v34 = vmul.f32 0.5, %v1026_v24 }
 0x35f   :  { %v1018_v28 = vmul.f32 %v2461_v53, %v1017_v26  ;;  %v1028_v17 = vmul.f32 %v1027_v34, %v2467_v30  ;;  %v1448_v26 = vld [vmem:[%s2734_s2 + $0x1f0] sm:$0xff] }
 0x360   :  { %1193 = vmatpush.msra.mxu1 %v1448_v26  ;;  %v1530_v26 = vld [vmem:[%s2733_s3 + $0xa] ss:$0 sm:$0xff] }
 0x361   :  { %v1029_v31 = vadd.f32 %v1028_v17, %v1018_v28  ;;  %v1447_v17 = vld [vmem:[%s2734_s2 + $0x1e8] sm:$0xff] }
 0x362   :  { %1194 = vmatpush.msra.mxu1 %v1447_v17 }
 0x363   :  { %v1030_v3 = vsub.f32 %v1007_v29, %v1029_v31 }
 0x365   :  { %v1031_v20 = vmul.f32 %v1030_v3, %v1030_v3  ;;  %v1055_v21 = vmul.f32 %v1525_v13, %v1030_v3 }
 0x367   :  { %v1032_v23 = vmul.f32 %v2461_v53, %v1031_v20  ;;  %v1042_v57 = vmul.f32 %v1031_v20, %v2467_v30  ;;  %v1446_v20 = vld [vmem:[%s2734_s2 + $0x1e0] sm:$0xff] }
 0x368   :  { %1195 = vmatpush.msra.mxu1 %v1446_v20 }
 0x369   :  { %v1033_v61 = vsel %vm907_vm5, %v1032_v23, 0.0  ;;  %v1043_v2 = vsel %vm907_vm5, %v1042_v57, 0.0 }
 0x36a   :  { %v1034_v54 = vrot.slane %v1033_v61, 4  ;;  %v1044_v14 = vrot.slane %v1043_v2, 4 }
 0x36c   :  { %v1035_v43 = vadd.f32 %v1034_v54, %v1033_v61  ;;  %v1045_v50 = vadd.f32 %v1044_v14, %v1043_v2  ;;  %v1445_v61 = vld [vmem:[%s2734_s2 + $0x1d8] sm:$0xff]  ;;  %v1444_v14 = vld [vmem:[%s2734_s2 + $0x1d0] sm:$0xff] }
 0x36d   :  { %1196 = vmatpush.msra.mxu1 %v1445_v61 }
 0x36e   :  { %v1036_v32 = vrot.slane %v1035_v43, 2  ;;  %v1046_v46 = vrot.slane %v1045_v50, 2 }
 0x36f   :  { %1197 = vmatpush.msra.mxu1 %v1444_v14 }
 0x370   :  { %v1037_v0 = vadd.f32 %v1036_v32, %v1035_v43  ;;  %v1047_v6 = vadd.f32 %v1046_v46, %v1045_v50  ;;  %v1443_v50 = vld [vmem:[%s2734_s2 + $0x1c8] sm:$0xff]  ;;  %v1442_v46 = vld [vmem:[%s2734_s2 + $0x1c0] sm:$0xff] }
 0x371   :  { %1198 = vmatpush.msra.mxu1 %v1443_v50 }
 0x372   :  { %v1038_v38 = vrot.slane %v1037_v0, 1  ;;  %v1048_v1 = vrot.slane %v1047_v6, 1 }
 0x373   :  { %1199 = vmatpush.msra.mxu1 %v1442_v46 }
 0x374   :  { %v1039_v15 = vadd.f32 %v1038_v38, %v1037_v0  ;;  %v1049_v8 = vadd.f32 %v1048_v1, %v1047_v6  ;;  %v1441_v0 = vld [vmem:[%s2734_s2 + $0x1b8] sm:$0xff] }
 0x375   :  { %1200 = vmatpush.msra.mxu1 %v1441_v0  ;;  %v1464_v0 = vld [vmem:[%s2734_s2 + $0x270] sm:$0xff] }
 0x376   :  { %v1040_v44 = vmul.f32 0.5, %v1039_v15  ;;  %v1050_v5 = vmul.f32 0.5, %v1049_v8 }
 0x377   :  { %1201 = vmatpush.msra.mxu1 %v1440_v39  ;;  %v1463_v39 = vld [vmem:[%s2734_s2 + $0x268] sm:$0xff] }
 0x378   :  { %v1041_v49 = vmul.f32 %v2461_v53, %v1040_v44  ;;  %v1051_v40 = vmul.f32 %v1050_v5, %v2467_v30  ;;  %v1438_v44 = vld [vmem:[%s2734_s2 + $0x1a0] sm:$0xff] }
 0x379   :  { %1202 = vmatpush.msra.mxu1 %v1439_v10  ;;  %v1462_v10 = vld [vmem:[%s2734_s2 + $0x260] sm:$0xff] }
 0x37a   :  { %v1052_v25 = vadd.f32 %v1051_v40, %v1041_v49  ;;  %v1437_v40 = vld [vmem:[%s2734_s2 + $0x198] sm:$0xff] }
 0x37b   :  { %1203 = vmatpush.msra.mxu1 %v1438_v44  ;;  %v1461_v44 = vld [vmem:[%s2734_s2 + $0x258] sm:$0xff] }
 0x37c   :  { %v1056_v27 = vadd.f32 1e-05, %v1052_v25 }
 0x37d   :  { %1204 = vmatpush.msra.mxu1 %v1437_v40 }
 0x37e   :  { %1538 = vrsqrt.f32 %v1056_v27  ;;  %vm1063_vm10 = vweird.f32 %v1056_v27 }
 0x384   :  { %v1539_v16 = vpop.eup %1538 }
 0x385   :  { %v1058_v33 = vmul.f32 %v1539_v16, %v1056_v27  ;;  %vm1064_vm9 = vweird.f32 %v1539_v16 }
 0x386   :  { %vm1065_vm11 = vmor %vm1063_vm10, %vm1064_vm9  ;;  %vm1350_vm9 = vcmask 1041408  }
 0x387   :  { %v1059_v52 = vmul.f32 %v1539_v16, %v1058_v33 }
 0x389   :  { %v1060_v9 = vmul.f32 0.5, %v1059_v52 }
 0x38b   :  { %v1061_v62 = vsub.f32 1.5, %v1060_v9  ;;  %v1435_v9 = vld [vmem:[%s2734_s2 + $0x188] sm:$0xff] }
 0x38d   :  { %v1062_v22 = vmul.f32 %v1539_v16, %v1061_v62 }
 0x38f   :  { %v1066_v12 = vsel %vm1065_vm11, %v1539_v16, %v1062_v22  ;;  %v1436_v16 = vld [vmem:[%s2734_s2 + $0x190] sm:$0xff]  ;;  %v1434_v22 = vld [vmem:[%s2734_s2 + $0x180] sm:$0xff]  ;;  %vm1389_vm11 = vcmask 1040384  }
 0x390   :  { %v1067_v4 = vmul.f32 %v1066_v12, %v1055_v21  ;;  %1205 = vmatpush.msra.mxu1 %v1436_v16  ;;  %v1458_v16 = vld [vmem:[%s2734_s2 + $0x240] sm:$0xff] }
 0x392   :  { %v1070_v56 = vadd.f32 %v1526_v18, %v1067_v4  ;;  %1206 = vmatpush.msra.mxu1 %v1435_v9  ;;  %v1457_v9 = vld [vmem:[%s2734_s2 + $0x238] sm:$0xff] }
 0x394   :  { %v1071_v29 = vmax.f32 %v1070_v56, 0.0  ;;  %1207 = vmatpush.msra.mxu1 %v1434_v22  ;;  %v1456_v22 = vld [vmem:[%s2734_s2 + $0x230] sm:$0xff] }
 0x396   :  { %1107 = vmatmul.f32.vlgmr.msrb.gmra.mxu3 %v1071_v29 }
 0x419   :  { %v1108_v48 = vpop.f32.mrf.mxu3 }
 0x41a   :  { %v1109_v37 = vadd.f32 %v1527_v63, %v1108_v48 }
 0x41c   :  { %v1111_v42 = vmul.f32 %v2461_v53, %v1109_v37  ;;  %v1121_v35 = vmul.f32 %v1109_v37, %v2467_v30 }
 0x41e   :  { %v1112_v19 = vsel %vm907_vm5, %v1111_v42, 0.0  ;;  %v1122_v36 = vsel %vm907_vm5, %v1121_v35, 0.0 }
 0x41f   :  { %v1113_v58 = vrot.slane %v1112_v19, 4  ;;  %v1123_v51 = vrot.slane %v1122_v36, 4 }
 0x421   :  { %v1114_v11 = vadd.f32 %v1113_v58, %v1112_v19  ;;  %v1124_v41 = vadd.f32 %v1123_v51, %v1122_v36  ;;  %v1528_v36 = vld [vmem:[%s2733_s3 + $0x8] ss:$0 sm:$0xff] }
 0x423   :  { %v1115_v55 = vrot.slane %v1114_v11, 2  ;;  %v1125_v45 = vrot.slane %v1124_v41, 2 }
 0x425   :  { %v1116_v47 = vadd.f32 %v1115_v55, %v1114_v11  ;;  %v1126_v24 = vadd.f32 %v1125_v45, %v1124_v41  ;;  %v1529_v41 = vld [vmem:[%s2733_s3 + $0x9] ss:$0 sm:$0xff] }
 0x427   :  { %v1117_v34 = vrot.slane %v1116_v47, 1  ;;  %v1127_v28 = vrot.slane %v1126_v24, 1 }
 0x429   :  { %v1118_v31 = vadd.f32 %v1117_v34, %v1116_v47  ;;  %v1128_v3 = vadd.f32 %v1127_v28, %v1126_v24 }
 0x42b   :  { %v1119_v23 = vmul.f32 0.5, %v1118_v31  ;;  %v1129_v57 = vmul.f32 0.5, %v1128_v3 }
 0x42d   :  { %v1120_v2 = vmul.f32 %v2461_v53, %v1119_v23  ;;  %v1130_v54 = vmul.f32 %v1129_v57, %v2467_v30 }
 0x42f   :  { %v1131_v43 = vadd.f32 %v1130_v54, %v1120_v2 }
 0x431   :  { %v1132_v32 = vsub.f32 %v1109_v37, %v1131_v43 }
 0x433   :  { %v1133_v60 = vmul.f32 %v1132_v32, %v1132_v32  ;;  %v1157_v11 = vmul.f32 %v1528_v36, %v1132_v32  ;;  %v1465_v32 = vld [vmem:[%s2734_s2 + $0x278] sm:$0xff] }
 0x434   :  { %1294 = vmatpush.msra.mxu2 %v1465_v32 }
 0x435   :  { %v1134_v6 = vmul.f32 %v2461_v53, %v1133_v60  ;;  %v1144_v7 = vmul.f32 %v1133_v60, %v2467_v30 }
 0x436   :  { %1295 = vmatpush.msra.mxu2 %v1464_v0 }
 0x437   :  { %v1135_v38 = vsel %vm907_vm5, %v1134_v6, 0.0  ;;  %v1145_v1 = vsel %vm907_vm5, %v1144_v7, 0.0 }
 0x438   :  { %v1136_v15 = vrot.slane %v1135_v38, 4  ;;  %v1146_v8 = vrot.slane %v1145_v1, 4  ;;  %1296 = vmatpush.msra.mxu2 %v1463_v39 }
 0x43a   :  { %v1137_v5 = vadd.f32 %v1136_v15, %v1135_v38  ;;  %v1147_v49 = vadd.f32 %v1146_v8, %v1145_v1  ;;  %1297 = vmatpush.msra.mxu2 %v1462_v10 }
 0x43c   :  { %v1138_v25 = vrot.slane %v1137_v5, 2  ;;  %v1148_v27 = vrot.slane %v1147_v49, 2  ;;  %1298 = vmatpush.msra.mxu2 %v1461_v44 }
 0x43e   :  { %v1139_v33 = vadd.f32 %v1138_v25, %v1137_v5  ;;  %v1149_v52 = vadd.f32 %v1148_v27, %v1147_v49  ;;  %v1460_v49 = vld [vmem:[%s2734_s2 + $0x250] sm:$0xff]  ;;  %v1459_v25 = vld [vmem:[%s2734_s2 + $0x248] sm:$0xff] }
 0x43f   :  { %1299 = vmatpush.msra.mxu2 %v1460_v49 }
 0x440   :  { %v1140_v13 = vrot.slane %v1139_v33, 1  ;;  %v1150_v62 = vrot.slane %v1149_v52, 1 }
 0x441   :  { %1300 = vmatpush.msra.mxu2 %v1459_v25 }
 0x442   :  { %v1141_v21 = vadd.f32 %v1140_v13, %v1139_v33  ;;  %v1151_v18 = vadd.f32 %v1150_v62, %v1149_v52 }
 0x443   :  { %1301 = vmatpush.msra.mxu2 %v1458_v16 }
 0x444   :  { %v1142_v12 = vmul.f32 0.5, %v1141_v21  ;;  %v1152_v4 = vmul.f32 0.5, %v1151_v18 }
 0x445   :  { %1302 = vmatpush.msra.mxu2 %v1457_v9 }
 0x446   :  { %v1143_v56 = vmul.f32 %v2461_v53, %v1142_v12  ;;  %v1153_v29 = vmul.f32 %v1152_v4, %v2467_v30  ;;  %v1455_v12 = vld [vmem:[%s2734_s2 + $0x228] sm:$0xff] }
 0x447   :  { %1303 = vmatpush.msra.mxu2 %v1456_v22 }
 0x448   :  { %v1154_v63 = vadd.f32 %v1153_v29, %v1143_v56  ;;  %v1454_v29 = vld [vmem:[%s2734_s2 + $0x220] sm:$0xff] }
 0x449   :  { %1304 = vmatpush.msra.mxu2 %v1455_v12 }
 0x44a   :  { %v1158_v48 = vadd.f32 1e-05, %v1154_v63 }
 0x44b   :  { %1305 = vmatpush.msra.mxu2 %v1454_v29  ;;  %v1553_v29 = vmov 0  }
 0x44c   :  { %1540 = vrsqrt.f32 %v1158_v48  ;;  %vm1165_vm13 = vweird.f32 %v1158_v48  ;;  %1518 = vset.pattern.permute.xlu2 %v1553_v29  ;;  %1519 = vset.pattern.permute.xlu0 %v1553_v29 }
 0x452   :  { %v1541_v37 = vpop.eup %1540 }
 0x453   :  { %v1160_v42 = vmul.f32 %v1541_v37, %v1158_v48  ;;  %vm1166_vm12 = vweird.f32 %v1541_v37 }
 0x454   :  { %vm1167_vm14 = vmor %vm1165_vm13, %vm1166_vm12 }
 0x455   :  { %v1161_v35 = vmul.f32 %v1541_v37, %v1160_v42 }
 0x457   :  { %v1162_v19 = vmul.f32 0.5, %v1161_v35 }
 0x459   :  { %v1163_v58 = vsub.f32 1.5, %v1162_v19  ;;  %v1452_v19 = vld [vmem:[%s2734_s2 + $0x210] sm:$0xff] }
 0x45b   :  { %v1164_v51 = vmul.f32 %v1541_v37, %v1163_v58 }
 0x45d   :  { %v1168_v55 = vsel %vm1167_vm14, %v1541_v37, %v1164_v51  ;;  %v1453_v37 = vld [vmem:[%s2734_s2 + $0x218] sm:$0xff]  ;;  %v1451_v51 = vld [vmem:[%s2734_s2 + $0x208] sm:$0xff] }
 0x45e   :  { %v1169_v45 = vmul.f32 %v1168_v55, %v1157_v11  ;;  %1306 = vmatpush.msra.mxu2 %v1453_v37  ;;  %v1450_v55 = vld [vmem:[%s2734_s2 + $0x200] sm:$0xff] }
 0x460   :  { %v2645_v59 = vadd.f32 %v1529_v41, %v1169_v45  ;;  %1307 = vmatpush.msra.mxu2 %v1452_v19 }
 0x462   :  { %1208 = vmatmul.f32.vlgmr.msra.gmra.mxu1 %v2645_v59  ;;  %v1330_v47 = vmul.f32 %v2645_v59, %v2645_v59  ;;  %1308 = vmatpush.msra.mxu2 %v1451_v51 }
 0x464   :  { %v1331_v24 = vsel %vm907_vm5, %v1330_v47, 0.0  ;;  %1309 = vmatpush.msra.mxu2 %v1450_v55 }
 0x465   :  { %1332 = vadd.xlane.f32.xlu0 %v1331_v24 }
 0x4df   :  { %v1209_v34 = vpop.f32.mrf.mxu1 }
 0x4e0   :  { %v1210_v28 = vadd.f32 %v1530_v26, %v1209_v34 }
 0x4e2   :  { %v1212_v17 = vmul.f32 %v2461_v53, %v1210_v28  ;;  %v1222_v31 = vmul.f32 %v1210_v28, %v2467_v30 }
 0x4e4   :  { %v1213_v3 = vsel %vm907_vm5, %v1212_v17, 0.0  ;;  %v1223_v20 = vsel %vm907_vm5, %v1222_v31, 0.0 }
 0x4e5   :  { %v1214_v23 = vrot.slane %v1213_v3, 4  ;;  %v1224_v57 = vrot.slane %v1223_v20, 4 }
 0x4e7   :  { %v1215_v61 = vadd.f32 %v1214_v23, %v1213_v3  ;;  %v1225_v2 = vadd.f32 %v1224_v57, %v1223_v20  ;;  %v1531_v23 = vld [vmem:[%s2733_s3 + $0xb] ss:$0 sm:$0xff] }
 0x4e9   :  { %v1216_v54 = vrot.slane %v1215_v61, 2  ;;  %v1226_v14 = vrot.slane %v1225_v2, 2 }
 0x4eb   :  { %v1217_v43 = vadd.f32 %v1216_v54, %v1215_v61  ;;  %v1227_v50 = vadd.f32 %v1226_v14, %v1225_v2 }
 0x4ed   :  { %v1218_v46 = vrot.slane %v1217_v43, 1  ;;  %v1228_v60 = vrot.slane %v1227_v50, 1 }
 0x4ef   :  { %v1219_v6 = vadd.f32 %v1218_v46, %v1217_v43  ;;  %v1229_v7 = vadd.f32 %v1228_v60, %v1227_v50  ;;  %v1533_v50 = vld [vmem:[%s2733_s3 + $0xd] ss:$0 sm:$0xff] }
 0x4f1   :  { %v1220_v38 = vmul.f32 0.5, %v1219_v6  ;;  %v1230_v1 = vmul.f32 0.5, %v1229_v7  ;;  %v1333_v6 = vpop.xlane.xlu0 %1332 }
 0x4f2   :  { %v1334_v7 = vmax.f32 %v1333_v6, 1e-24 }
 0x4f3   :  { %v1221_v15 = vmul.f32 %v2461_v53, %v1220_v38  ;;  %v1231_v8 = vmul.f32 %v1230_v1, %v2467_v30 }
 0x4f4   :  { %vm1341_vm3 = vweird.f32 %v1334_v7 }
 0x4f5   :  { %v1232_v5 = vadd.f32 %v1231_v8, %v1221_v15 }
 0x4f7   :  { %v1233_v40 = vsub.f32 %v1210_v28, %v1232_v5 }
 0x4f9   :  { %v1234_v27 = vmul.f32 %v1233_v40, %v1233_v40  ;;  %v1258_v2 = vmul.f32 %v1531_v23, %v1233_v40 }
 0x4fb   :  { %v1235_v33 = vmul.f32 %v2461_v53, %v1234_v27  ;;  %v1245_v52 = vmul.f32 %v1234_v27, %v2467_v30 }
 0x4fd   :  { %v1236_v13 = vsel %vm907_vm5, %v1235_v33, 0.0  ;;  %v1246_v62 = vsel %vm907_vm5, %v1245_v52, 0.0 }
 0x4fe   :  { %v1237_v21 = vrot.slane %v1236_v13, 4  ;;  %v1247_v18 = vrot.slane %v1246_v62, 4 }
 0x500   :  { %v1238_v4 = vadd.f32 %v1237_v21, %v1236_v13  ;;  %v1248_v56 = vadd.f32 %v1247_v18, %v1246_v62 }
 0x502   :  { %v1239_v63 = vrot.slane %v1238_v4, 2  ;;  %v1249_v48 = vrot.slane %v1248_v56, 2 }
 0x504   :  { %v1240_v42 = vadd.f32 %v1239_v63, %v1238_v4  ;;  %v1250_v35 = vadd.f32 %v1249_v48, %v1248_v56 }
 0x506   :  { %v1241_v36 = vrot.slane %v1240_v42, 1  ;;  %v1251_v58 = vrot.slane %v1250_v35, 1 }
 0x508   :  { %v1242_v11 = vadd.f32 %v1241_v36, %v1240_v42  ;;  %v1252_v41 = vadd.f32 %v1251_v58, %v1250_v35 }
 0x50a   :  { %v1243_v45 = vmul.f32 0.5, %v1242_v11  ;;  %v1253_v47 = vmul.f32 0.5, %v1252_v41 }
 0x50c   :  { %v1244_v24 = vmul.f32 %v2461_v53, %v1243_v45  ;;  %v1254_v26 = vmul.f32 %v1253_v47, %v2467_v30  ;;  %v1532_v53 = vld [vmem:[%s2733_s3 + $0xc] ss:$0 sm:$0xff] }
 0x50e   :  { %v1255_v34 = vadd.f32 %v1254_v26, %v1244_v24 }
 0x510   :  { %v1259_v28 = vadd.f32 1e-05, %v1255_v34 }
 0x512   :  { %1542 = vrsqrt.f32 %v1259_v28  ;;  %vm1266_vm0 = vweird.f32 %v1259_v28 }
 0x513   :  { %1544 = vrsqrt.f32 %v1334_v7 }
 0x518   :  { %v1543_v17 = vpop.eup %1542 }
 0x519   :  { %v1261_v31 = vmul.f32 %v1543_v17, %v1259_v28  ;;  %vm1267_vm15 = vweird.f32 %v1543_v17  ;;  %v1545_v39 = vpop.eup %1544 }
 0x51a   :  { %vm1268_vm1 = vmor %vm1266_vm0, %vm1267_vm15  ;;  %v1336_v38 = vmul.f32 %v1545_v39, %v1334_v7  ;;  %vm1342_vm2 = vweird.f32 %v1545_v39 }
 0x51b   :  { %v1262_v3 = vmul.f32 %v1543_v17, %v1261_v31  ;;  %vm1343_vm4 = vmor %vm1341_vm3, %vm1342_vm2 }
 0x51c   :  { %v1337_v1 = vmul.f32 %v1545_v39, %v1336_v38 }
 0x51d   :  { %v1263_v20 = vmul.f32 0.5, %v1262_v3 }
 0x51e   :  { %v1338_v8 = vmul.f32 0.5, %v1337_v1 }
 0x51f   :  { %v1264_v57 = vsub.f32 1.5, %v1263_v20 }
 0x520   :  { %v1339_v44 = vsub.f32 1.5, %v1338_v8 }
 0x521   :  { %v1265_v61 = vmul.f32 %v1543_v17, %v1264_v57 }
 0x522   :  { %v1340_v49 = vmul.f32 %v1545_v39, %v1339_v44 }
 0x523   :  { %v1269_v30 = vsel %vm1268_vm1, %v1543_v17, %v1265_v61 }
 0x524   :  { %v1270_v54 = vmul.f32 %v1269_v30, %v1258_v2  ;;  %v1344_v16 = vsel %vm1343_vm4, %v1545_v39, %v1340_v49 }
 0x525   :  { %v1345_v52 = vmul.f32 %v1344_v16, %v2645_v59  ;;  %v1554_v59 = vmov 2.0  }
 0x526   :  { %v1273_v14 = vadd.f32 %v1532_v53, %v1270_v54 }
 0x527   :  { %v1370_v22 = vrot.slane %v1345_v52, 6  ;;  %v1347_v12 = vrot.slane %v1345_v52, 2 }
 0x528   :  { %v1274_v43 = vmax.f32 %v1273_v14, 0.0 }
 0x52a   :  { %1310 = vmatmul.f32.vlgmr.msra.gmra.mxu2 %v1274_v43 }
 0x5ad   :  { %v1311_v32 = vpop.f32.mrf.mxu2 }
 0x5ae   :  { %v1312_v46 = vadd.f32 %v1533_v50, %v1311_v32 }
 0x5b0   :  { %v1314_v60 = vmul.f32 %v1312_v46, %v1312_v46 }
 0x5b2   :  { %v1315_v0 = vsel %vm907_vm5, %v1314_v60, 0.0 }
 0x5b3   :  { %1316 = vadd.xlane.f32.xlu0 %v1315_v0 }
 0x626   :  { %v1317_v10 = vpop.xlane.xlu0 %1316 }
 0x627   :  { %v1318_v15 = vmax.f32 %v1317_v10, 1e-24 }
 0x629   :  { %1546 = vrsqrt.f32 %v1318_v15  ;;  %vm1325_vm6 = vweird.f32 %v1318_v15 }
 0x62a   :  { %1548 = vrcp.f32 %v1554_v59 }
 0x62f   :  { %v1547_v5 = vpop.eup %1546 }
 0x630   :  { %v1320_v40 = vmul.f32 %v1547_v5, %v1318_v15  ;;  %vm1326_vm5 = vweird.f32 %v1547_v5  ;;  %v1549_v63 = vpop.eup %1548 }
 0x631   :  { %vm1327_vm7 = vmor %vm1325_vm6, %vm1326_vm5  ;;  %v1362_v42 = vmul.f32 2.0, %v1549_v63  ;;  %vm1366_vm10 = vweird.f32 %v1549_v63 }
 0x632   :  { %v1321_v25 = vmul.f32 %v1547_v5, %v1320_v40 }
 0x633   :  { %v1363_v36 = vsub.f32 1.0, %v1362_v42 }
 0x634   :  { %v1322_v27 = vmul.f32 0.5, %v1321_v25 }
 0x635   :  { %v1364_v55 = vmul.f32 %v1549_v63, %v1363_v36 }
 0x636   :  { %v1323_v33 = vsub.f32 1.5, %v1322_v27 }
 0x637   :  { %v1365_v34 = vadd.f32 %v1549_v63, %v1364_v55 }
 0x638   :  { %v1324_v9 = vmul.f32 %v1547_v5, %v1323_v33 }
 0x639   :  { %v1367_v3 = vsel %vm1366_vm10, %v1549_v63, %v1365_v34 }
 0x63a   :  { %v1328_v13 = vsel %vm1327_vm7, %v1547_v5, %v1324_v9 }
 0x63b   :  { %v1329_v62 = vmul.f32 %v1328_v13, %v1312_v46 }
 0x63d   :  { %v1372_v21 = vmul.f32 %v1370_v22, %v1329_v62  ;;  %v1349_v4 = vmul.f32 %v1347_v12, %v1329_v62 }
 0x63f   :  { %v1374_v18 = vsel %vm1373_vm8, %v1372_v21, 0.0  ;;  %v1351_v56 = vsel %vm1350_vm9, %v1349_v4, 0.0 }
 0x640   :  { %1375 = vadd.xlane.f32.xlu1 %v1374_v18 }
 0x648   :  { %1352 = vadd.xlane.f32.xlu1 %v1351_v56 }
 0x6b3   :  { %v1376_v48 = vpop.xlane.xlu1 %1375 }
 0x6b4   :  { %v1378_v37 = vrot.slane %v1376_v48, 2 }
 0x6b6   :  { %v1380_v35 = vsel %vm1350_vm9, %v1378_v37, 0.0 }
 0x6b7   :  { %v1381_v19 = vrot.slane %v1380_v35, 4 }
 0x6b9   :  { %v1382_v58 = vadd.f32 %v1381_v19, %v1380_v35 }
 0x6bb   :  { %v1383_v51 = vrot.slane %v1382_v58, 2  ;;  %v1353_v11 = vpop.xlane.xlu1 %1352 }
 0x6bc   :  { %v1354_v41 = vsel %vm1350_vm9, %v1353_v11, 0.0 }
 0x6bd   :  { %v1384_v45 = vadd.f32 %v1383_v51, %v1382_v58  ;;  %v1355_v47 = vrot.slane %v1354_v41, 4 }
 0x6bf   :  { %v1385_v24 = vrot.slane %v1384_v45, 1  ;;  %v1356_v26 = vadd.f32 %v1355_v47, %v1354_v41 }
 0x6c1   :  { %v1357_v28 = vrot.slane %v1356_v26, 2  ;;  %v1386_v31 = vadd.f32 %v1385_v24, %v1384_v45 }
 0x6c3   :  { %v1358_v17 = vadd.f32 %v1357_v28, %v1356_v26  ;;  %v1387_v57 = vmul.f32 %v1386_v31, %v1367_v3 }
 0x6c5   :  { %v1359_v20 = vrot.slane %v1358_v17, 1  ;;  %v1388_v53 = vmul.f32 -0.5, %v1387_v57 }
 0x6c7   :  { %v1360_v23 = vadd.f32 %v1359_v20, %v1358_v17 }
 0x6c9   :  { %v1368_v61 = vmul.f32 %v1367_v3, %v1360_v23 }
 0x6cb   :  { %v1369_v2 = vmul.f32 -0.5, %v1368_v61 }
 0x6cd   :  { %v1390_v30 = vsel %vm1389_vm11, %v1369_v2, %v1388_v53 }
 0x6ce   :  { %1393 = vperm.xlu2 %1518, %v1390_v30  }
 0x728   :  { %v1394_v54 = vpop.permute.xlu2 %1393 }
 0x729   :  { %1396 = vst [vmem:[%s2735_s4] sm:$0x3] %v1394_v54 }

</bundles_post_ra>
